<compile_context>
chip_gen: v6e
topology: v6e:2x2x1
jax: 0.10.0
libtpu: 0.0.40
codegen_flags: <defaults>
</compile_context>

<pallas_src>
import functools

import jax
import jax.numpy as jnp
from jax.experimental import pallas as pl
from jax.experimental.pallas import tpu as pltpu


GP = 128  # packed gate-block width: all 4 gates of one LSTM live in one vreg


# ------------------------------- kernel -------------------------------------

def _gate_masks(h, width):
    """Lane masks for the packed [i|f|g|o] gate block (g-gate lanes use tanh)."""
    lane = jax.lax.broadcasted_iota(jnp.int32, (1, width), dimension=1)
    is_g = (lane >= 2 * h) & (lane < 3 * h)
    scale = jnp.where(is_g, 1.0, 0.5).astype(jnp.float32)
    return is_g, scale


def _cell_step(g, c, h_dim, is_g, scale):
    """One LSTM cell update from packed pre-activations g (bb, GP).

    Single EUP pass: sigmoid(x) = 0.5*tanh(0.5*x) + 0.5, so i/f/o lanes are
    pre-scaled by 0.5, ONE tanh covers the packed vreg, and the affine fixup is
    a cheap VPU select.  Padded lanes (>= 4*h_dim) are never read.
    """
    t = jnp.tanh(g * scale)
    act = jnp.where(is_g, t, 0.5 * t + 0.5)
    i_g = act[:, 0 * h_dim:1 * h_dim]
    f_g = act[:, 1 * h_dim:2 * h_dim]
    g_g = act[:, 2 * h_dim:3 * h_dim]
    o_g = act[:, 3 * h_dim:4 * h_dim]
    c_new = f_g * c + i_g * g_g
    h_new = o_g * jnp.tanh(c_new)
    return h_new, c_new


def tae_encoder_kernel(x_ref, w1_ref, b1_ref,
                       wih1_ref, whh1_ref, bg1_ref,
                       w2_ref, bg2_ref, z_ref, *, T, bb, h1, h2):
    f32, bf16 = jnp.float32, jnp.bfloat16

    # ---- batched prologue (off the serial critical path) -------------------
    x = x_ref[0]                                                  # (T*bb, c_in) bf16
    a = jnp.dot(x, w1_ref[...], preferred_element_type=f32) + b1_ref[...]
    a = jnp.where(a > 0, a, 0.01 * a)                             # LeakyReLU(0.01)
    # LSTM1 input projection hoisted over all T steps (one batched MXU matmul).
    g1_all = jnp.dot(a.astype(bf16), wih1_ref[...],
                     preferred_element_type=f32) + bg1_ref[...]   # (T*bb, GP)

    is_g1, sc1 = _gate_masks(h1, GP)
    is_g2, sc2 = _gate_masks(h2, GP)
    whh1 = whh1_ref[...]
    w2 = w2_ref[...]
    bg2 = bg2_ref[...]

    h1s = jnp.zeros((bb, h1), f32)
    c1 = jnp.zeros((bb, h1), f32)
    h2s = jnp.zeros((bb, h2), f32)
    c2 = jnp.zeros((bb, h2), f32)

    def lstm2_step(s1_in, h2_state, c2_state):
        # Fused input+recurrent projection: [tanh(h1_{t-1}) | h2_{t-1}] @ [Wih2; Whh2]
        xin = jnp.concatenate([s1_in, h2_state], axis=1).astype(bf16)  # (bb, h1+h2)
        g = jnp.dot(xin, w2, preferred_element_type=f32) + bg2
        h2n, c2n = _cell_step(g, c2_state, h2, is_g2, sc2)
        return h2n, c2n, jnp.tanh(h2n)                            # fused nn.Tanh()

    # ---- interleaved recurrences: LSTM1 step t || LSTM2 step t-1 ------------
    # The two chains are independent within one iteration, so the scheduler can
    # fill each other's MXU/EUP latency bubbles.
    # NOTE: static unroll is sized for small T; for T >~ 32 switch to
    # lax.fori_loop with an h/c carry and a VMEM scratch for the outputs.
    outs2 = []
    s1_prev = None
    for t in range(T):
        g = g1_all[t * bb:(t + 1) * bb, :] + jnp.dot(
            h1s.astype(bf16), whh1, preferred_element_type=f32)
        h1s, c1 = _cell_step(g, c1, h1, is_g1, sc1)
        s1_t = jnp.tanh(h1s)                                      # fused nn.Tanh()
        if t > 0:
            h2s, c2, o = lstm2_step(s1_prev, h2s, c2)
            outs2.append(o)
        s1_prev = s1_t
    h2s, c2, o = lstm2_step(s1_prev, h2s, c2)                     # LSTM2 step T-1
    outs2.append(o)

    # ---- single lane-dense store of the whole (bb, T*h2) output row ---------
    z_ref[0] = jnp.concatenate(outs2, axis=1)


# ------------------------------- wrapper -------------------------------------

def prepare_params(params):
    """One-time weight re-layout (call ONCE, outside the per-step forward).

    Right-matmul weights, combined biases, the four gates packed contiguously
    with only the concatenated gate block padded to GP=128 lanes, MXU operands
    pre-cast to bf16, and LSTM2's [W_ih; W_hh] row-stacked for the fused dot.
    """
    h1 = params["whh1"].shape[0]
    h2 = params["whh2"].shape[0]
    assert 4 * h1 <= GP and 4 * h2 <= GP, "gate block must fit in one 128-lane vreg"

    def pad_lanes(w):
        return jnp.pad(w, ((0, 0), (0, GP - w.shape[1])))

    w2_stack = jnp.concatenate([params["wih2"], params["whh2"]], axis=0)
    return dict(
        w1=params["w1"].astype(jnp.bfloat16),
        b1=params["b1"].astype(jnp.float32),
        wih1=pad_lanes(params["wih1"]).astype(jnp.bfloat16),
        whh1=pad_lanes(params["whh1"]).astype(jnp.bfloat16),
        bg1=pad_lanes(params["bl1"]).astype(jnp.float32),
        w2=pad_lanes(w2_stack).astype(jnp.bfloat16),
        bg2=pad_lanes(params["bl2"]).astype(jnp.float32),
    )


def _num_tensorcores():
    """2 on megacore chips (v7x); 1 on v5e/v6e, where splitting the batch grid
    would only serialize the recurrence."""
    try:
        kind = jax.devices()[0].device_kind.lower()
    except Exception:
        return 1
    return 2 if "v7" in kind else 1


def tae_encoder_forward(x_btc, prep, *, h1, h2):
    """x_btc: (B, T, 28) f32.  prep: prepare_params(...).  Returns (B, T, h2)."""
    B, T, c_in = x_btc.shape

    # Batch grid: split only when a second TensorCore can actually run it.
    n_tc = _num_tensorcores()
    n_blocks = n_tc if (n_tc > 1 and B % n_tc == 0) else 1
    bb = B // n_blocks

    # Block-major / time-major input relayout (tiny; removes in-kernel reshape).
    x3 = jnp.transpose(x_btc.reshape(n_blocks, bb, T, c_in), (0, 2, 1, 3))
    x3 = x3.reshape(n_blocks, T * bb, c_in).astype(jnp.bfloat16)

    def full(arr):
        return pl.BlockSpec(arr.shape, lambda i, n=arr.ndim: (0,) * n)

    kernel = functools.partial(tae_encoder_kernel, T=T, bb=bb, h1=h1, h2=h2)

    # VMEM budget from the actual (double-buffered) block sizes, clamped to a
    # value valid on all generations (<= 32 MiB << v7x's 64 MiB VMEM).
    blk_bytes = sum(int(a.size) * a.dtype.itemsize
                    for a in (x3, *prep.values())) + B * T * h2 * 4
    vmem_limit = int(min(32 << 20, max(4 << 20, 4 * blk_bytes)))

    z3 = pl.pallas_call(
        kernel,
        out_shape=jax.ShapeDtypeStruct((n_blocks, bb, T * h2), jnp.float32),
        grid=(n_blocks,),
        in_specs=[
            pl.BlockSpec((1, T * bb, c_in), lambda i: (i, 0, 0)),
            full(prep["w1"]), full(prep["b1"]),
            full(prep["wih1"]), full(prep["whh1"]), full(prep["bg1"]),
            full(prep["w2"]), full(prep["bg2"]),
        ],
        out_specs=pl.BlockSpec((1, bb, T * h2), lambda i: (i, 0, 0)),
        compiler_params=pltpu.CompilerParams(
            dimension_semantics=("parallel",),
            vmem_limit_bytes=vmem_limit),
    )(x3, prep["w1"], prep["b1"],
      prep["wih1"], prep["whh1"], prep["bg1"],
      prep["w2"], prep["bg2"])

    return z3.reshape(B, T, h2)   # free reshape back to (B, T, H2)


# ----------------------- params & pure-JAX reference -------------------------

def init_params(key, c_in=28, f1=32, h1=16, h2=8):
    ks = jax.random.split(key, 8)

    def u(k, shape, scale=0.2):
        return jax.random.uniform(k, shape, jnp.float32, -scale, scale)

    return dict(
        # Conv1d(28 -> f1, k=1): weight stored as (c_in, f1), bias (1, f1)
        w1=u(ks[0], (c_in, f1)), b1=u(ks[1], (1, f1)),
        # LSTM1 (input f1, hidden h1): W_ih^T (f1, 4h1), W_hh^T (h1, 4h1),
        # bias = bias_ih + bias_hh combined, PyTorch gate order [i, f, g, o].
        wih1=u(ks[2], (f1, 4 * h1)), whh1=u(ks[3], (h1, 4 * h1)),
        bl1=u(ks[4], (1, 4 * h1)),
        # LSTM2 (input h1, hidden h2)
        wih2=u(ks[5], (h1, 4 * h2)), whh2=u(ks[6], (h2, 4 * h2)),
        bl2=u(ks[7], (1, 4 * h2)),
    )


def _lstm_ref(seq, wih, whh, b, h_dim):
    B, T, _ = seq.shape
    h = jnp.zeros((B, h_dim), jnp.float32)
    c = jnp.zeros((B, h_dim), jnp.float32)
    outs = []
    for t in range(T):
        g = seq[:, t, :] @ wih + h @ whh + b
        i_g = jax.nn.sigmoid(g[:, 0 * h_dim:1 * h_dim])
        f_g = jax.nn.sigmoid(g[:, 1 * h_dim:2 * h_dim])
        g_g = jnp.tanh(g[:, 2 * h_dim:3 * h_dim])
        o_g = jax.nn.sigmoid(g[:, 3 * h_dim:4 * h_dim])
        c = f_g * c + i_g * g_g
        h = o_g * jnp.tanh(c)
        outs.append(h)
    return jnp.stack(outs, axis=1)


def tae_encoder_ref(x, params):
    """Pure-JAX f32 reference of TAE_encoder.forward (correctness check)."""
    a = x @ params["w1"] + params["b1"]
    a = jnp.where(a > 0, a, 0.01 * a)
    h1 = params["whh1"].shape[0]
    h2 = params["whh2"].shape[0]
    s1 = jnp.tanh(_lstm_ref(a, params["wih1"], params["whh1"], params["bl1"], h1))
    s2 = jnp.tanh(_lstm_ref(s1, params["wih2"], params["whh2"], params["bl2"], h2))
    return s2


# --------------------------------- main ---------------------------------------

if __name__ == "__main__":
    B, T, C_IN = 2, 8, 28        # batch, serie length, input channels (fixed 28)
    F1, H1, H2 = 32, 16, 8       # filter_1, filter_lstm = [16, 8]

    key = jax.random.PRNGKey(0)
    kx, kp = jax.random.split(key)
    x = jax.random.normal(kx, (B, T, C_IN), jnp.float32)
    params = init_params(kp, c_in=C_IN, f1=F1, h1=H1, h2=H2)

    # One-time weight re-layout, hoisted out of the per-call forward.
    prep = prepare_params(params)
    fwd = jax.jit(functools.partial(tae_encoder_forward, h1=H1, h2=H2))

    z = fwd(x, prep)
    jax.block_until_ready(z)

    assert z.shape == (B, T, H2)
    assert bool(jnp.all(jnp.isfinite(z)))

    # f32 XLA reference vs bf16-MXU / f32-accumulate kernel: loose tolerance;
    # structural errors would be orders of magnitude larger.
    z_ref = tae_encoder_ref(x, params)
    err = float(jnp.max(jnp.abs(z - z_ref)))
    assert err < 5e-2, f"kernel/reference mismatch: max abs err = {err}"

    print("KERNEL_OK")
</pallas_src>

<mosaic_0001>
module attributes {stable_mosaic.version = 11 : i64} {
  func.func @tae_encoder_kernel(%arg0: i32, %arg1: memref<1x16x28xbf16, #tpu.memory_space<vmem>>, %arg2: memref<28x32xbf16, #tpu.memory_space<vmem>>, %arg3: memref<1x32xf32, #tpu.memory_space<vmem>>, %arg4: memref<32x128xbf16, #tpu.memory_space<vmem>>, %arg5: memref<16x128xbf16, #tpu.memory_space<vmem>>, %arg6: memref<1x128xf32, #tpu.memory_space<vmem>>, %arg7: memref<24x128xbf16, #tpu.memory_space<vmem>>, %arg8: memref<1x128xf32, #tpu.memory_space<vmem>>, %arg9: memref<1x2x64xf32, #tpu.memory_space<vmem>>) attributes {dimension_semantics = [#tpu.dimension_semantics<parallel>], iteration_bounds = array<i64: 1>, scalar_prefetch = 0 : i64, scratch_operands = 0 : i64, tpu.core_type = #tpu.core_type<tc>, window_params = [{transform_indices = @transform_0, window_bounds = array<i64: 1, 16, 28>}, {pipeline_mode = #tpu.pipeline_mode<synchronous>, transform_indices = @transform_1, window_bounds = array<i64: 28, 32>}, {pipeline_mode = #tpu.pipeline_mode<synchronous>, transform_indices = @transform_2, window_bounds = array<i64: 1, 32>}, {pipeline_mode = #tpu.pipeline_mode<synchronous>, transform_indices = @transform_3, window_bounds = array<i64: 32, 128>}, {pipeline_mode = #tpu.pipeline_mode<synchronous>, transform_indices = @transform_4, window_bounds = array<i64: 16, 128>}, {pipeline_mode = #tpu.pipeline_mode<synchronous>, transform_indices = @transform_5, window_bounds = array<i64: 1, 128>}, {pipeline_mode = #tpu.pipeline_mode<synchronous>, transform_indices = @transform_6, window_bounds = array<i64: 24, 128>}, {pipeline_mode = #tpu.pipeline_mode<synchronous>, transform_indices = @transform_7, window_bounds = array<i64: 1, 128>}, {transform_indices = @transform_8, window_bounds = array<i64: 1, 2, 64>}]} {
    %c0 = arith.constant 0 : index
    %c0_0 = arith.constant 0 : index
    %c0_1 = arith.constant 0 : index
    %0 = vector.load %arg1[%c0, %c0_0, %c0_1] : memref<1x16x28xbf16, #tpu.memory_space<vmem>>, vector<1x16x28xbf16>
    %1 = vector.shape_cast %0 : vector<1x16x28xbf16> to vector<16x28xbf16>
    %c0_2 = arith.constant 0 : index
    %c0_3 = arith.constant 0 : index
    %2 = vector.load %arg2[%c0_2, %c0_3] : memref<28x32xbf16, #tpu.memory_space<vmem>>, vector<28x32xbf16>
    %cst = arith.constant dense<0.000000e+00> : vector<16x32xf32>
    %3 = tpu.matmul %1, %2, %cst {dimension_numbers = #tpu.dot_dimension_numbers<[1], [0], [0], [1], [0, 0, 1, 1], [], []>} : vector<16x28xbf16>, vector<28x32xbf16>, vector<16x32xf32> -> vector<16x32xf32>
    %c0_4 = arith.constant 0 : index
    %c0_5 = arith.constant 0 : index
    %4 = vector.load %arg3[%c0_4, %c0_5] : memref<1x32xf32, #tpu.memory_space<vmem>>, vector<1x32xf32>
    %5 = vector.broadcast %4 : vector<1x32xf32> to vector<16x32xf32>
    %6 = arith.addf %3, %5 : vector<16x32xf32>
    %cst_6 = arith.constant 0.000000e+00 : f32
    %7 = vector.broadcast %cst_6 : f32 to vector<16x32xf32>
    %8 = arith.cmpf ogt, %6, %7 : vector<16x32xf32>
    %cst_7 = arith.constant 0.00999999977 : f32
    %9 = vector.broadcast %cst_7 : f32 to vector<16x32xf32>
    %10 = arith.mulf %9, %6 : vector<16x32xf32>
    %11 = arith.select %8, %6, %10 : vector<16x32xi1>, vector<16x32xf32>
    %12 = arith.truncf %11 : vector<16x32xf32> to vector<16x32xbf16>
    %c0_8 = arith.constant 0 : index
    %c0_9 = arith.constant 0 : index
    %13 = vector.load %arg4[%c0_8, %c0_9] : memref<32x128xbf16, #tpu.memory_space<vmem>>, vector<32x128xbf16>
    %cst_10 = arith.constant dense<0.000000e+00> : vector<16x128xf32>
    %14 = tpu.matmul %12, %13, %cst_10 {dimension_numbers = #tpu.dot_dimension_numbers<[1], [0], [0], [1], [0, 0, 1, 1], [], []>} : vector<16x32xbf16>, vector<32x128xbf16>, vector<16x128xf32> -> vector<16x128xf32>
    %c0_11 = arith.constant 0 : index
    %c0_12 = arith.constant 0 : index
    %15 = vector.load %arg6[%c0_11, %c0_12] : memref<1x128xf32, #tpu.memory_space<vmem>>, vector<1x128xf32>
    %16 = vector.broadcast %15 : vector<1x128xf32> to vector<16x128xf32>
    %17 = arith.addf %14, %16 : vector<16x128xf32>
    %18 = tpu.iota {dimensions = array<i32: 1>} : vector<1x128xi32>
    %c32_i32 = arith.constant 32 : i32
    %19 = vector.broadcast %c32_i32 : i32 to vector<1x128xi32>
    %20 = arith.cmpi sge, %18, %19 : vector<1x128xi32>
    %c48_i32 = arith.constant 48 : i32
    %21 = vector.broadcast %c48_i32 : i32 to vector<1x128xi32>
    %22 = arith.cmpi slt, %18, %21 : vector<1x128xi32>
    %23 = arith.andi %20, %22 : vector<1x128xi1>
    %cst_13 = arith.constant 1.000000e+00 : f32
    %cst_14 = arith.constant 5.000000e-01 : f32
    %24 = vector.broadcast %cst_13 : f32 to vector<1x128xf32>
    %25 = vector.broadcast %cst_14 : f32 to vector<1x128xf32>
    %26 = arith.select %23, %24, %25 : vector<1x128xi1>, vector<1x128xf32>
    %27 = tpu.iota {dimensions = array<i32: 1>} : vector<1x128xi32>
    %c16_i32 = arith.constant 16 : i32
    %28 = vector.broadcast %c16_i32 : i32 to vector<1x128xi32>
    %29 = arith.cmpi sge, %27, %28 : vector<1x128xi32>
    %c24_i32 = arith.constant 24 : i32
    %30 = vector.broadcast %c24_i32 : i32 to vector<1x128xi32>
    %31 = arith.cmpi slt, %27, %30 : vector<1x128xi32>
    %32 = arith.andi %29, %31 : vector<1x128xi1>
    %cst_15 = arith.constant 1.000000e+00 : f32
    %cst_16 = arith.constant 5.000000e-01 : f32
    %33 = vector.broadcast %cst_15 : f32 to vector<1x128xf32>
    %34 = vector.broadcast %cst_16 : f32 to vector<1x128xf32>
    %35 = arith.select %32, %33, %34 : vector<1x128xi1>, vector<1x128xf32>
    %c0_17 = arith.constant 0 : index
    %c0_18 = arith.constant 0 : index
    %36 = vector.load %arg5[%c0_17, %c0_18] : memref<16x128xbf16, #tpu.memory_space<vmem>>, vector<16x128xbf16>
    %c0_19 = arith.constant 0 : index
    %c0_20 = arith.constant 0 : index
    %37 = vector.load %arg7[%c0_19, %c0_20] : memref<24x128xbf16, #tpu.memory_space<vmem>>, vector<24x128xbf16>
    %c0_21 = arith.constant 0 : index
    %c0_22 = arith.constant 0 : index
    %38 = vector.load %arg8[%c0_21, %c0_22] : memref<1x128xf32, #tpu.memory_space<vmem>>, vector<1x128xf32>
    %cst_23 = arith.constant 0.000000e+00 : f32
    %39 = vector.broadcast %cst_23 : f32 to vector<2x16xf32>
    %cst_24 = arith.constant 0.000000e+00 : f32
    %40 = vector.broadcast %cst_24 : f32 to vector<2x16xf32>
    %cst_25 = arith.constant 0.000000e+00 : f32
    %41 = vector.broadcast %cst_25 : f32 to vector<2x8xf32>
    %cst_26 = arith.constant 0.000000e+00 : f32
    %42 = vector.broadcast %cst_26 : f32 to vector<2x8xf32>
    %43 = vector.extract_strided_slice %17 {offsets = [0, 0], sizes = [2, 128], strides = [1, 1]} : vector<16x128xf32> to vector<2x128xf32>
    %44 = arith.truncf %39 : vector<2x16xf32> to vector<2x16xbf16>
    %cst_27 = arith.constant dense<0.000000e+00> : vector<2x128xf32>
    %45 = tpu.matmul %44, %36, %cst_27 {dimension_numbers = #tpu.dot_dimension_numbers<[1], [0], [0], [1], [0, 0, 1, 1], [], []>} : vector<2x16xbf16>, vector<16x128xbf16>, vector<2x128xf32> -> vector<2x128xf32>
    %46 = arith.addf %43, %45 : vector<2x128xf32>
    %47 = vector.broadcast %26 : vector<1x128xf32> to vector<2x128xf32>
    %48 = arith.mulf %46, %47 : vector<2x128xf32>
    %49 = math.tanh %48 : vector<2x128xf32>
    %cst_28 = arith.constant 5.000000e-01 : f32
    %50 = vector.broadcast %cst_28 : f32 to vector<2x128xf32>
    %51 = arith.mulf %50, %49 : vector<2x128xf32>
    %cst_29 = arith.constant 5.000000e-01 : f32
    %52 = vector.broadcast %cst_29 : f32 to vector<2x128xf32>
    %53 = arith.addf %51, %52 : vector<2x128xf32>
    %54 = vector.shape_cast %23 : vector<1x128xi1> to vector<1x128xi1>
    %55 = vector.broadcast %54 : vector<1x128xi1> to vector<2x128xi1>
    %56 = arith.select %55, %49, %53 : vector<2x128xi1>, vector<2x128xf32>
    %57 = vector.extract_strided_slice %56 {offsets = [0, 0], sizes = [2, 16], strides = [1, 1]} : vector<2x128xf32> to vector<2x16xf32>
    %58 = vector.extract_strided_slice %56 {offsets = [0, 16], sizes = [2, 16], strides = [1, 1]} : vector<2x128xf32> to vector<2x16xf32>
    %59 = vector.extract_strided_slice %56 {offsets = [0, 32], sizes = [2, 16], strides = [1, 1]} : vector<2x128xf32> to vector<2x16xf32>
    %60 = vector.extract_strided_slice %56 {offsets = [0, 48], sizes = [2, 16], strides = [1, 1]} : vector<2x128xf32> to vector<2x16xf32>
    %61 = arith.mulf %58, %40 : vector<2x16xf32>
    %62 = arith.mulf %57, %59 : vector<2x16xf32>
    %63 = arith.addf %61, %62 : vector<2x16xf32>
    %64 = math.tanh %63 : vector<2x16xf32>
    %65 = arith.mulf %60, %64 : vector<2x16xf32>
    %66 = math.tanh %65 : vector<2x16xf32>
    %67 = vector.extract_strided_slice %17 {offsets = [2, 0], sizes = [2, 128], strides = [1, 1]} : vector<16x128xf32> to vector<2x128xf32>
    %68 = arith.truncf %65 : vector<2x16xf32> to vector<2x16xbf16>
    %cst_30 = arith.constant dense<0.000000e+00> : vector<2x128xf32>
    %69 = tpu.matmul %68, %36, %cst_30 {dimension_numbers = #tpu.dot_dimension_numbers<[1], [0], [0], [1], [0, 0, 1, 1], [], []>} : vector<2x16xbf16>, vector<16x128xbf16>, vector<2x128xf32> -> vector<2x128xf32>
    %70 = arith.addf %67, %69 : vector<2x128xf32>
    %71 = vector.broadcast %26 : vector<1x128xf32> to vector<2x128xf32>
    %72 = arith.mulf %70, %71 : vector<2x128xf32>
    %73 = math.tanh %72 : vector<2x128xf32>
    %cst_31 = arith.constant 5.000000e-01 : f32
    %74 = vector.broadcast %cst_31 : f32 to vector<2x128xf32>
    %75 = arith.mulf %74, %73 : vector<2x128xf32>
    %cst_32 = arith.constant 5.000000e-01 : f32
    %76 = vector.broadcast %cst_32 : f32 to vector<2x128xf32>
    %77 = arith.addf %75, %76 : vector<2x128xf32>
    %78 = vector.shape_cast %23 : vector<1x128xi1> to vector<1x128xi1>
    %79 = vector.broadcast %78 : vector<1x128xi1> to vector<2x128xi1>
    %80 = arith.select %79, %73, %77 : vector<2x128xi1>, vector<2x128xf32>
    %81 = vector.extract_strided_slice %80 {offsets = [0, 0], sizes = [2, 16], strides = [1, 1]} : vector<2x128xf32> to vector<2x16xf32>
    %82 = vector.extract_strided_slice %80 {offsets = [0, 16], sizes = [2, 16], strides = [1, 1]} : vector<2x128xf32> to vector<2x16xf32>
    %83 = vector.extract_strided_slice %80 {offsets = [0, 32], sizes = [2, 16], strides = [1, 1]} : vector<2x128xf32> to vector<2x16xf32>
    %84 = vector.extract_strided_slice %80 {offsets = [0, 48], sizes = [2, 16], strides = [1, 1]} : vector<2x128xf32> to vector<2x16xf32>
    %85 = arith.mulf %82, %63 : vector<2x16xf32>
    %86 = arith.mulf %81, %83 : vector<2x16xf32>
    %87 = arith.addf %85, %86 : vector<2x16xf32>
    %88 = math.tanh %87 : vector<2x16xf32>
    %89 = arith.mulf %84, %88 : vector<2x16xf32>
    %90 = math.tanh %89 : vector<2x16xf32>
    %91 = tpu.concatenate %66, %41 in 1 : vector<2x16xf32>, vector<2x8xf32> -> vector<2x24xf32>
    %92 = arith.truncf %91 : vector<2x24xf32> to vector<2x24xbf16>
    %cst_33 = arith.constant dense<0.000000e+00> : vector<2x128xf32>
    %93 = tpu.matmul %92, %37, %cst_33 {dimension_numbers = #tpu.dot_dimension_numbers<[1], [0], [0], [1], [0, 0, 1, 1], [], []>} : vector<2x24xbf16>, vector<24x128xbf16>, vector<2x128xf32> -> vector<2x128xf32>
    %94 = vector.broadcast %38 : vector<1x128xf32> to vector<2x128xf32>
    %95 = arith.addf %93, %94 : vector<2x128xf32>
    %96 = vector.broadcast %35 : vector<1x128xf32> to vector<2x128xf32>
    %97 = arith.mulf %95, %96 : vector<2x128xf32>
    %98 = math.tanh %97 : vector<2x128xf32>
    %cst_34 = arith.constant 5.000000e-01 : f32
    %99 = vector.broadcast %cst_34 : f32 to vector<2x128xf32>
    %100 = arith.mulf %99, %98 : vector<2x128xf32>
    %cst_35 = arith.constant 5.000000e-01 : f32
    %101 = vector.broadcast %cst_35 : f32 to vector<2x128xf32>
    %102 = arith.addf %100, %101 : vector<2x128xf32>
    %103 = vector.shape_cast %32 : vector<1x128xi1> to vector<1x128xi1>
    %104 = vector.broadcast %103 : vector<1x128xi1> to vector<2x128xi1>
    %105 = arith.select %104, %98, %102 : vector<2x128xi1>, vector<2x128xf32>
    %106 = vector.extract_strided_slice %105 {offsets = [0, 0], sizes = [2, 8], strides = [1, 1]} : vector<2x128xf32> to vector<2x8xf32>
    %107 = vector.extract_strided_slice %105 {offsets = [0, 8], sizes = [2, 8], strides = [1, 1]} : vector<2x128xf32> to vector<2x8xf32>
    %108 = vector.extract_strided_slice %105 {offsets = [0, 16], sizes = [2, 8], strides = [1, 1]} : vector<2x128xf32> to vector<2x8xf32>
    %109 = vector.extract_strided_slice %105 {offsets = [0, 24], sizes = [2, 8], strides = [1, 1]} : vector<2x128xf32> to vector<2x8xf32>
    %110 = arith.mulf %107, %42 : vector<2x8xf32>
    %111 = arith.mulf %106, %108 : vector<2x8xf32>
    %112 = arith.addf %110, %111 : vector<2x8xf32>
    %113 = math.tanh %112 : vector<2x8xf32>
    %114 = arith.mulf %109, %113 : vector<2x8xf32>
    %115 = math.tanh %114 : vector<2x8xf32>
    %116 = vector.extract_strided_slice %17 {offsets = [4, 0], sizes = [2, 128], strides = [1, 1]} : vector<16x128xf32> to vector<2x128xf32>
    %117 = arith.truncf %89 : vector<2x16xf32> to vector<2x16xbf16>
    %cst_36 = arith.constant dense<0.000000e+00> : vector<2x128xf32>
    %118 = tpu.matmul %117, %36, %cst_36 {dimension_numbers = #tpu.dot_dimension_numbers<[1], [0], [0], [1], [0, 0, 1, 1], [], []>} : vector<2x16xbf16>, vector<16x128xbf16>, vector<2x128xf32> -> vector<2x128xf32>
    %119 = arith.addf %116, %118 : vector<2x128xf32>
    %120 = vector.broadcast %26 : vector<1x128xf32> to vector<2x128xf32>
    %121 = arith.mulf %119, %120 : vector<2x128xf32>
    %122 = math.tanh %121 : vector<2x128xf32>
    %cst_37 = arith.constant 5.000000e-01 : f32
    %123 = vector.broadcast %cst_37 : f32 to vector<2x128xf32>
    %124 = arith.mulf %123, %122 : vector<2x128xf32>
    %cst_38 = arith.constant 5.000000e-01 : f32
    %125 = vector.broadcast %cst_38 : f32 to vector<2x128xf32>
    %126 = arith.addf %124, %125 : vector<2x128xf32>
    %127 = vector.shape_cast %23 : vector<1x128xi1> to vector<1x128xi1>
    %128 = vector.broadcast %127 : vector<1x128xi1> to vector<2x128xi1>
    %129 = arith.select %128, %122, %126 : vector<2x128xi1>, vector<2x128xf32>
    %130 = vector.extract_strided_slice %129 {offsets = [0, 0], sizes = [2, 16], strides = [1, 1]} : vector<2x128xf32> to vector<2x16xf32>
    %131 = vector.extract_strided_slice %129 {offsets = [0, 16], sizes = [2, 16], strides = [1, 1]} : vector<2x128xf32> to vector<2x16xf32>
    %132 = vector.extract_strided_slice %129 {offsets = [0, 32], sizes = [2, 16], strides = [1, 1]} : vector<2x128xf32> to vector<2x16xf32>
    %133 = vector.extract_strided_slice %129 {offsets = [0, 48], sizes = [2, 16], strides = [1, 1]} : vector<2x128xf32> to vector<2x16xf32>
    %134 = arith.mulf %131, %87 : vector<2x16xf32>
    %135 = arith.mulf %130, %132 : vector<2x16xf32>
    %136 = arith.addf %134, %135 : vector<2x16xf32>
    %137 = math.tanh %136 : vector<2x16xf32>
    %138 = arith.mulf %133, %137 : vector<2x16xf32>
    %139 = math.tanh %138 : vector<2x16xf32>
    %140 = tpu.concatenate %90, %114 in 1 : vector<2x16xf32>, vector<2x8xf32> -> vector<2x24xf32>
    %141 = arith.truncf %140 : vector<2x24xf32> to vector<2x24xbf16>
    %cst_39 = arith.constant dense<0.000000e+00> : vector<2x128xf32>
    %142 = tpu.matmul %141, %37, %cst_39 {dimension_numbers = #tpu.dot_dimension_numbers<[1], [0], [0], [1], [0, 0, 1, 1], [], []>} : vector<2x24xbf16>, vector<24x128xbf16>, vector<2x128xf32> -> vector<2x128xf32>
    %143 = vector.broadcast %38 : vector<1x128xf32> to vector<2x128xf32>
    %144 = arith.addf %142, %143 : vector<2x128xf32>
    %145 = vector.broadcast %35 : vector<1x128xf32> to vector<2x128xf32>
    %146 = arith.mulf %144, %145 : vector<2x128xf32>
    %147 = math.tanh %146 : vector<2x128xf32>
    %cst_40 = arith.constant 5.000000e-01 : f32
    %148 = vector.broadcast %cst_40 : f32 to vector<2x128xf32>
    %149 = arith.mulf %148, %147 : vector<2x128xf32>
    %cst_41 = arith.constant 5.000000e-01 : f32
    %150 = vector.broadcast %cst_41 : f32 to vector<2x128xf32>
    %151 = arith.addf %149, %150 : vector<2x128xf32>
    %152 = vector.shape_cast %32 : vector<1x128xi1> to vector<1x128xi1>
    %153 = vector.broadcast %152 : vector<1x128xi1> to vector<2x128xi1>
    %154 = arith.select %153, %147, %151 : vector<2x128xi1>, vector<2x128xf32>
    %155 = vector.extract_strided_slice %154 {offsets = [0, 0], sizes = [2, 8], strides = [1, 1]} : vector<2x128xf32> to vector<2x8xf32>
    %156 = vector.extract_strided_slice %154 {offsets = [0, 8], sizes = [2, 8], strides = [1, 1]} : vector<2x128xf32> to vector<2x8xf32>
    %157 = vector.extract_strided_slice %154 {offsets = [0, 16], sizes = [2, 8], strides = [1, 1]} : vector<2x128xf32> to vector<2x8xf32>
    %158 = vector.extract_strided_slice %154 {offsets = [0, 24], sizes = [2, 8], strides = [1, 1]} : vector<2x128xf32> to vector<2x8xf32>
    %159 = arith.mulf %156, %112 : vector<2x8xf32>
    %160 = arith.mulf %155, %157 : vector<2x8xf32>
    %161 = arith.addf %159, %160 : vector<2x8xf32>
    %162 = math.tanh %161 : vector<2x8xf32>
    %163 = arith.mulf %158, %162 : vector<2x8xf32>
    %164 = math.tanh %163 : vector<2x8xf32>
    %165 = vector.extract_strided_slice %17 {offsets = [6, 0], sizes = [2, 128], strides = [1, 1]} : vector<16x128xf32> to vector<2x128xf32>
    %166 = arith.truncf %138 : vector<2x16xf32> to vector<2x16xbf16>
    %cst_42 = arith.constant dense<0.000000e+00> : vector<2x128xf32>
    %167 = tpu.matmul %166, %36, %cst_42 {dimension_numbers = #tpu.dot_dimension_numbers<[1], [0], [0], [1], [0, 0, 1, 1], [], []>} : vector<2x16xbf16>, vector<16x128xbf16>, vector<2x128xf32> -> vector<2x128xf32>
    %168 = arith.addf %165, %167 : vector<2x128xf32>
    %169 = vector.broadcast %26 : vector<1x128xf32> to vector<2x128xf32>
    %170 = arith.mulf %168, %169 : vector<2x128xf32>
    %171 = math.tanh %170 : vector<2x128xf32>
    %cst_43 = arith.constant 5.000000e-01 : f32
    %172 = vector.broadcast %cst_43 : f32 to vector<2x128xf32>
    %173 = arith.mulf %172, %171 : vector<2x128xf32>
    %cst_44 = arith.constant 5.000000e-01 : f32
    %174 = vector.broadcast %cst_44 : f32 to vector<2x128xf32>
    %175 = arith.addf %173, %174 : vector<2x128xf32>
    %176 = vector.shape_cast %23 : vector<1x128xi1> to vector<1x128xi1>
    %177 = vector.broadcast %176 : vector<1x128xi1> to vector<2x128xi1>
    %178 = arith.select %177, %171, %175 : vector<2x128xi1>, vector<2x128xf32>
    %179 = vector.extract_strided_slice %178 {offsets = [0, 0], sizes = [2, 16], strides = [1, 1]} : vector<2x128xf32> to vector<2x16xf32>
    %180 = vector.extract_strided_slice %178 {offsets = [0, 16], sizes = [2, 16], strides = [1, 1]} : vector<2x128xf32> to vector<2x16xf32>
    %181 = vector.extract_strided_slice %178 {offsets = [0, 32], sizes = [2, 16], strides = [1, 1]} : vector<2x128xf32> to vector<2x16xf32>
    %182 = vector.extract_strided_slice %178 {offsets = [0, 48], sizes = [2, 16], strides = [1, 1]} : vector<2x128xf32> to vector<2x16xf32>
    %183 = arith.mulf %180, %136 : vector<2x16xf32>
    %184 = arith.mulf %179, %181 : vector<2x16xf32>
    %185 = arith.addf %183, %184 : vector<2x16xf32>
    %186 = math.tanh %185 : vector<2x16xf32>
    %187 = arith.mulf %182, %186 : vector<2x16xf32>
    %188 = math.tanh %187 : vector<2x16xf32>
    %189 = tpu.concatenate %139, %163 in 1 : vector<2x16xf32>, vector<2x8xf32> -> vector<2x24xf32>
    %190 = arith.truncf %189 : vector<2x24xf32> to vector<2x24xbf16>
    %cst_45 = arith.constant dense<0.000000e+00> : vector<2x128xf32>
    %191 = tpu.matmul %190, %37, %cst_45 {dimension_numbers = #tpu.dot_dimension_numbers<[1], [0], [0], [1], [0, 0, 1, 1], [], []>} : vector<2x24xbf16>, vector<24x128xbf16>, vector<2x128xf32> -> vector<2x128xf32>
    %192 = vector.broadcast %38 : vector<1x128xf32> to vector<2x128xf32>
    %193 = arith.addf %191, %192 : vector<2x128xf32>
    %194 = vector.broadcast %35 : vector<1x128xf32> to vector<2x128xf32>
    %195 = arith.mulf %193, %194 : vector<2x128xf32>
    %196 = math.tanh %195 : vector<2x128xf32>
    %cst_46 = arith.constant 5.000000e-01 : f32
    %197 = vector.broadcast %cst_46 : f32 to vector<2x128xf32>
    %198 = arith.mulf %197, %196 : vector<2x128xf32>
    %cst_47 = arith.constant 5.000000e-01 : f32
    %199 = vector.broadcast %cst_47 : f32 to vector<2x128xf32>
    %200 = arith.addf %198, %199 : vector<2x128xf32>
    %201 = vector.shape_cast %32 : vector<1x128xi1> to vector<1x128xi1>
    %202 = vector.broadcast %201 : vector<1x128xi1> to vector<2x128xi1>
    %203 = arith.select %202, %196, %200 : vector<2x128xi1>, vector<2x128xf32>
    %204 = vector.extract_strided_slice %203 {offsets = [0, 0], sizes = [2, 8], strides = [1, 1]} : vector<2x128xf32> to vector<2x8xf32>
    %205 = vector.extract_strided_slice %203 {offsets = [0, 8], sizes = [2, 8], strides = [1, 1]} : vector<2x128xf32> to vector<2x8xf32>
    %206 = vector.extract_strided_slice %203 {offsets = [0, 16], sizes = [2, 8], strides = [1, 1]} : vector<2x128xf32> to vector<2x8xf32>
    %207 = vector.extract_strided_slice %203 {offsets = [0, 24], sizes = [2, 8], strides = [1, 1]} : vector<2x128xf32> to vector<2x8xf32>
    %208 = arith.mulf %205, %161 : vector<2x8xf32>
    %209 = arith.mulf %204, %206 : vector<2x8xf32>
    %210 = arith.addf %208, %209 : vector<2x8xf32>
    %211 = math.tanh %210 : vector<2x8xf32>
    %212 = arith.mulf %207, %211 : vector<2x8xf32>
    %213 = math.tanh %212 : vector<2x8xf32>
    %214 = vector.extract_strided_slice %17 {offsets = [8, 0], sizes = [2, 128], strides = [1, 1]} : vector<16x128xf32> to vector<2x128xf32>
    %215 = arith.truncf %187 : vector<2x16xf32> to vector<2x16xbf16>
    %cst_48 = arith.constant dense<0.000000e+00> : vector<2x128xf32>
    %216 = tpu.matmul %215, %36, %cst_48 {dimension_numbers = #tpu.dot_dimension_numbers<[1], [0], [0], [1], [0, 0, 1, 1], [], []>} : vector<2x16xbf16>, vector<16x128xbf16>, vector<2x128xf32> -> vector<2x128xf32>
    %217 = arith.addf %214, %216 : vector<2x128xf32>
    %218 = vector.broadcast %26 : vector<1x128xf32> to vector<2x128xf32>
    %219 = arith.mulf %217, %218 : vector<2x128xf32>
    %220 = math.tanh %219 : vector<2x128xf32>
    %cst_49 = arith.constant 5.000000e-01 : f32
    %221 = vector.broadcast %cst_49 : f32 to vector<2x128xf32>
    %222 = arith.mulf %221, %220 : vector<2x128xf32>
    %cst_50 = arith.constant 5.000000e-01 : f32
    %223 = vector.broadcast %cst_50 : f32 to vector<2x128xf32>
    %224 = arith.addf %222, %223 : vector<2x128xf32>
    %225 = vector.shape_cast %23 : vector<1x128xi1> to vector<1x128xi1>
    %226 = vector.broadcast %225 : vector<1x128xi1> to vector<2x128xi1>
    %227 = arith.select %226, %220, %224 : vector<2x128xi1>, vector<2x128xf32>
    %228 = vector.extract_strided_slice %227 {offsets = [0, 0], sizes = [2, 16], strides = [1, 1]} : vector<2x128xf32> to vector<2x16xf32>
    %229 = vector.extract_strided_slice %227 {offsets = [0, 16], sizes = [2, 16], strides = [1, 1]} : vector<2x128xf32> to vector<2x16xf32>
    %230 = vector.extract_strided_slice %227 {offsets = [0, 32], sizes = [2, 16], strides = [1, 1]} : vector<2x128xf32> to vector<2x16xf32>
    %231 = vector.extract_strided_slice %227 {offsets = [0, 48], sizes = [2, 16], strides = [1, 1]} : vector<2x128xf32> to vector<2x16xf32>
    %232 = arith.mulf %229, %185 : vector<2x16xf32>
    %233 = arith.mulf %228, %230 : vector<2x16xf32>
    %234 = arith.addf %232, %233 : vector<2x16xf32>
    %235 = math.tanh %234 : vector<2x16xf32>
    %236 = arith.mulf %231, %235 : vector<2x16xf32>
    %237 = math.tanh %236 : vector<2x16xf32>
    %238 = tpu.concatenate %188, %212 in 1 : vector<2x16xf32>, vector<2x8xf32> -> vector<2x24xf32>
    %239 = arith.truncf %238 : vector<2x24xf32> to vector<2x24xbf16>
    %cst_51 = arith.constant dense<0.000000e+00> : vector<2x128xf32>
    %240 = tpu.matmul %239, %37, %cst_51 {dimension_numbers = #tpu.dot_dimension_numbers<[1], [0], [0], [1], [0, 0, 1, 1], [], []>} : vector<2x24xbf16>, vector<24x128xbf16>, vector<2x128xf32> -> vector<2x128xf32>
    %241 = vector.broadcast %38 : vector<1x128xf32> to vector<2x128xf32>
    %242 = arith.addf %240, %241 : vector<2x128xf32>
    %243 = vector.broadcast %35 : vector<1x128xf32> to vector<2x128xf32>
    %244 = arith.mulf %242, %243 : vector<2x128xf32>
    %245 = math.tanh %244 : vector<2x128xf32>
    %cst_52 = arith.constant 5.000000e-01 : f32
    %246 = vector.broadcast %cst_52 : f32 to vector<2x128xf32>
    %247 = arith.mulf %246, %245 : vector<2x128xf32>
    %cst_53 = arith.constant 5.000000e-01 : f32
    %248 = vector.broadcast %cst_53 : f32 to vector<2x128xf32>
    %249 = arith.addf %247, %248 : vector<2x128xf32>
    %250 = vector.shape_cast %32 : vector<1x128xi1> to vector<1x128xi1>
    %251 = vector.broadcast %250 : vector<1x128xi1> to vector<2x128xi1>
    %252 = arith.select %251, %245, %249 : vector<2x128xi1>, vector<2x128xf32>
    %253 = vector.extract_strided_slice %252 {offsets = [0, 0], sizes = [2, 8], strides = [1, 1]} : vector<2x128xf32> to vector<2x8xf32>
    %254 = vector.extract_strided_slice %252 {offsets = [0, 8], sizes = [2, 8], strides = [1, 1]} : vector<2x128xf32> to vector<2x8xf32>
    %255 = vector.extract_strided_slice %252 {offsets = [0, 16], sizes = [2, 8], strides = [1, 1]} : vector<2x128xf32> to vector<2x8xf32>
    %256 = vector.extract_strided_slice %252 {offsets = [0, 24], sizes = [2, 8], strides = [1, 1]} : vector<2x128xf32> to vector<2x8xf32>
    %257 = arith.mulf %254, %210 : vector<2x8xf32>
    %258 = arith.mulf %253, %255 : vector<2x8xf32>
    %259 = arith.addf %257, %258 : vector<2x8xf32>
    %260 = math.tanh %259 : vector<2x8xf32>
    %261 = arith.mulf %256, %260 : vector<2x8xf32>
    %262 = math.tanh %261 : vector<2x8xf32>
    %263 = vector.extract_strided_slice %17 {offsets = [10, 0], sizes = [2, 128], strides = [1, 1]} : vector<16x128xf32> to vector<2x128xf32>
    %264 = arith.truncf %236 : vector<2x16xf32> to vector<2x16xbf16>
    %cst_54 = arith.constant dense<0.000000e+00> : vector<2x128xf32>
    %265 = tpu.matmul %264, %36, %cst_54 {dimension_numbers = #tpu.dot_dimension_numbers<[1], [0], [0], [1], [0, 0, 1, 1], [], []>} : vector<2x16xbf16>, vector<16x128xbf16>, vector<2x128xf32> -> vector<2x128xf32>
    %266 = arith.addf %263, %265 : vector<2x128xf32>
    %267 = vector.broadcast %26 : vector<1x128xf32> to vector<2x128xf32>
    %268 = arith.mulf %266, %267 : vector<2x128xf32>
    %269 = math.tanh %268 : vector<2x128xf32>
    %cst_55 = arith.constant 5.000000e-01 : f32
    %270 = vector.broadcast %cst_55 : f32 to vector<2x128xf32>
    %271 = arith.mulf %270, %269 : vector<2x128xf32>
    %cst_56 = arith.constant 5.000000e-01 : f32
    %272 = vector.broadcast %cst_56 : f32 to vector<2x128xf32>
    %273 = arith.addf %271, %272 : vector<2x128xf32>
    %274 = vector.shape_cast %23 : vector<1x128xi1> to vector<1x128xi1>
    %275 = vector.broadcast %274 : vector<1x128xi1> to vector<2x128xi1>
    %276 = arith.select %275, %269, %273 : vector<2x128xi1>, vector<2x128xf32>
    %277 = vector.extract_strided_slice %276 {offsets = [0, 0], sizes = [2, 16], strides = [1, 1]} : vector<2x128xf32> to vector<2x16xf32>
    %278 = vector.extract_strided_slice %276 {offsets = [0, 16], sizes = [2, 16], strides = [1, 1]} : vector<2x128xf32> to vector<2x16xf32>
    %279 = vector.extract_strided_slice %276 {offsets = [0, 32], sizes = [2, 16], strides = [1, 1]} : vector<2x128xf32> to vector<2x16xf32>
    %280 = vector.extract_strided_slice %276 {offsets = [0, 48], sizes = [2, 16], strides = [1, 1]} : vector<2x128xf32> to vector<2x16xf32>
    %281 = arith.mulf %278, %234 : vector<2x16xf32>
    %282 = arith.mulf %277, %279 : vector<2x16xf32>
    %283 = arith.addf %281, %282 : vector<2x16xf32>
    %284 = math.tanh %283 : vector<2x16xf32>
    %285 = arith.mulf %280, %284 : vector<2x16xf32>
    %286 = math.tanh %285 : vector<2x16xf32>
    %287 = tpu.concatenate %237, %261 in 1 : vector<2x16xf32>, vector<2x8xf32> -> vector<2x24xf32>
    %288 = arith.truncf %287 : vector<2x24xf32> to vector<2x24xbf16>
    %cst_57 = arith.constant dense<0.000000e+00> : vector<2x128xf32>
    %289 = tpu.matmul %288, %37, %cst_57 {dimension_numbers = #tpu.dot_dimension_numbers<[1], [0], [0], [1], [0, 0, 1, 1], [], []>} : vector<2x24xbf16>, vector<24x128xbf16>, vector<2x128xf32> -> vector<2x128xf32>
    %290 = vector.broadcast %38 : vector<1x128xf32> to vector<2x128xf32>
    %291 = arith.addf %289, %290 : vector<2x128xf32>
    %292 = vector.broadcast %35 : vector<1x128xf32> to vector<2x128xf32>
    %293 = arith.mulf %291, %292 : vector<2x128xf32>
    %294 = math.tanh %293 : vector<2x128xf32>
    %cst_58 = arith.constant 5.000000e-01 : f32
    %295 = vector.broadcast %cst_58 : f32 to vector<2x128xf32>
    %296 = arith.mulf %295, %294 : vector<2x128xf32>
    %cst_59 = arith.constant 5.000000e-01 : f32
    %297 = vector.broadcast %cst_59 : f32 to vector<2x128xf32>
    %298 = arith.addf %296, %297 : vector<2x128xf32>
    %299 = vector.shape_cast %32 : vector<1x128xi1> to vector<1x128xi1>
    %300 = vector.broadcast %299 : vector<1x128xi1> to vector<2x128xi1>
    %301 = arith.select %300, %294, %298 : vector<2x128xi1>, vector<2x128xf32>
    %302 = vector.extract_strided_slice %301 {offsets = [0, 0], sizes = [2, 8], strides = [1, 1]} : vector<2x128xf32> to vector<2x8xf32>
    %303 = vector.extract_strided_slice %301 {offsets = [0, 8], sizes = [2, 8], strides = [1, 1]} : vector<2x128xf32> to vector<2x8xf32>
    %304 = vector.extract_strided_slice %301 {offsets = [0, 16], sizes = [2, 8], strides = [1, 1]} : vector<2x128xf32> to vector<2x8xf32>
    %305 = vector.extract_strided_slice %301 {offsets = [0, 24], sizes = [2, 8], strides = [1, 1]} : vector<2x128xf32> to vector<2x8xf32>
    %306 = arith.mulf %303, %259 : vector<2x8xf32>
    %307 = arith.mulf %302, %304 : vector<2x8xf32>
    %308 = arith.addf %306, %307 : vector<2x8xf32>
    %309 = math.tanh %308 : vector<2x8xf32>
    %310 = arith.mulf %305, %309 : vector<2x8xf32>
    %311 = math.tanh %310 : vector<2x8xf32>
    %312 = vector.extract_strided_slice %17 {offsets = [12, 0], sizes = [2, 128], strides = [1, 1]} : vector<16x128xf32> to vector<2x128xf32>
    %313 = arith.truncf %285 : vector<2x16xf32> to vector<2x16xbf16>
    %cst_60 = arith.constant dense<0.000000e+00> : vector<2x128xf32>
    %314 = tpu.matmul %313, %36, %cst_60 {dimension_numbers = #tpu.dot_dimension_numbers<[1], [0], [0], [1], [0, 0, 1, 1], [], []>} : vector<2x16xbf16>, vector<16x128xbf16>, vector<2x128xf32> -> vector<2x128xf32>
    %315 = arith.addf %312, %314 : vector<2x128xf32>
    %316 = vector.broadcast %26 : vector<1x128xf32> to vector<2x128xf32>
    %317 = arith.mulf %315, %316 : vector<2x128xf32>
    %318 = math.tanh %317 : vector<2x128xf32>
    %cst_61 = arith.constant 5.000000e-01 : f32
    %319 = vector.broadcast %cst_61 : f32 to vector<2x128xf32>
    %320 = arith.mulf %319, %318 : vector<2x128xf32>
    %cst_62 = arith.constant 5.000000e-01 : f32
    %321 = vector.broadcast %cst_62 : f32 to vector<2x128xf32>
    %322 = arith.addf %320, %321 : vector<2x128xf32>
    %323 = vector.shape_cast %23 : vector<1x128xi1> to vector<1x128xi1>
    %324 = vector.broadcast %323 : vector<1x128xi1> to vector<2x128xi1>
    %325 = arith.select %324, %318, %322 : vector<2x128xi1>, vector<2x128xf32>
    %326 = vector.extract_strided_slice %325 {offsets = [0, 0], sizes = [2, 16], strides = [1, 1]} : vector<2x128xf32> to vector<2x16xf32>
    %327 = vector.extract_strided_slice %325 {offsets = [0, 16], sizes = [2, 16], strides = [1, 1]} : vector<2x128xf32> to vector<2x16xf32>
    %328 = vector.extract_strided_slice %325 {offsets = [0, 32], sizes = [2, 16], strides = [1, 1]} : vector<2x128xf32> to vector<2x16xf32>
    %329 = vector.extract_strided_slice %325 {offsets = [0, 48], sizes = [2, 16], strides = [1, 1]} : vector<2x128xf32> to vector<2x16xf32>
    %330 = arith.mulf %327, %283 : vector<2x16xf32>
    %331 = arith.mulf %326, %328 : vector<2x16xf32>
    %332 = arith.addf %330, %331 : vector<2x16xf32>
    %333 = math.tanh %332 : vector<2x16xf32>
    %334 = arith.mulf %329, %333 : vector<2x16xf32>
    %335 = math.tanh %334 : vector<2x16xf32>
    %336 = tpu.concatenate %286, %310 in 1 : vector<2x16xf32>, vector<2x8xf32> -> vector<2x24xf32>
    %337 = arith.truncf %336 : vector<2x24xf32> to vector<2x24xbf16>
    %cst_63 = arith.constant dense<0.000000e+00> : vector<2x128xf32>
    %338 = tpu.matmul %337, %37, %cst_63 {dimension_numbers = #tpu.dot_dimension_numbers<[1], [0], [0], [1], [0, 0, 1, 1], [], []>} : vector<2x24xbf16>, vector<24x128xbf16>, vector<2x128xf32> -> vector<2x128xf32>
    %339 = vector.broadcast %38 : vector<1x128xf32> to vector<2x128xf32>
    %340 = arith.addf %338, %339 : vector<2x128xf32>
    %341 = vector.broadcast %35 : vector<1x128xf32> to vector<2x128xf32>
    %342 = arith.mulf %340, %341 : vector<2x128xf32>
    %343 = math.tanh %342 : vector<2x128xf32>
    %cst_64 = arith.constant 5.000000e-01 : f32
    %344 = vector.broadcast %cst_64 : f32 to vector<2x128xf32>
    %345 = arith.mulf %344, %343 : vector<2x128xf32>
    %cst_65 = arith.constant 5.000000e-01 : f32
    %346 = vector.broadcast %cst_65 : f32 to vector<2x128xf32>
    %347 = arith.addf %345, %346 : vector<2x128xf32>
    %348 = vector.shape_cast %32 : vector<1x128xi1> to vector<1x128xi1>
    %349 = vector.broadcast %348 : vector<1x128xi1> to vector<2x128xi1>
    %350 = arith.select %349, %343, %347 : vector<2x128xi1>, vector<2x128xf32>
    %351 = vector.extract_strided_slice %350 {offsets = [0, 0], sizes = [2, 8], strides = [1, 1]} : vector<2x128xf32> to vector<2x8xf32>
    %352 = vector.extract_strided_slice %350 {offsets = [0, 8], sizes = [2, 8], strides = [1, 1]} : vector<2x128xf32> to vector<2x8xf32>
    %353 = vector.extract_strided_slice %350 {offsets = [0, 16], sizes = [2, 8], strides = [1, 1]} : vector<2x128xf32> to vector<2x8xf32>
    %354 = vector.extract_strided_slice %350 {offsets = [0, 24], sizes = [2, 8], strides = [1, 1]} : vector<2x128xf32> to vector<2x8xf32>
    %355 = arith.mulf %352, %308 : vector<2x8xf32>
    %356 = arith.mulf %351, %353 : vector<2x8xf32>
    %357 = arith.addf %355, %356 : vector<2x8xf32>
    %358 = math.tanh %357 : vector<2x8xf32>
    %359 = arith.mulf %354, %358 : vector<2x8xf32>
    %360 = math.tanh %359 : vector<2x8xf32>
    %361 = vector.extract_strided_slice %17 {offsets = [14, 0], sizes = [2, 128], strides = [1, 1]} : vector<16x128xf32> to vector<2x128xf32>
    %362 = arith.truncf %334 : vector<2x16xf32> to vector<2x16xbf16>
    %cst_66 = arith.constant dense<0.000000e+00> : vector<2x128xf32>
    %363 = tpu.matmul %362, %36, %cst_66 {dimension_numbers = #tpu.dot_dimension_numbers<[1], [0], [0], [1], [0, 0, 1, 1], [], []>} : vector<2x16xbf16>, vector<16x128xbf16>, vector<2x128xf32> -> vector<2x128xf32>
    %364 = arith.addf %361, %363 : vector<2x128xf32>
    %365 = vector.broadcast %26 : vector<1x128xf32> to vector<2x128xf32>
    %366 = arith.mulf %364, %365 : vector<2x128xf32>
    %367 = math.tanh %366 : vector<2x128xf32>
    %cst_67 = arith.constant 5.000000e-01 : f32
    %368 = vector.broadcast %cst_67 : f32 to vector<2x128xf32>
    %369 = arith.mulf %368, %367 : vector<2x128xf32>
    %cst_68 = arith.constant 5.000000e-01 : f32
    %370 = vector.broadcast %cst_68 : f32 to vector<2x128xf32>
    %371 = arith.addf %369, %370 : vector<2x128xf32>
    %372 = vector.shape_cast %23 : vector<1x128xi1> to vector<1x128xi1>
    %373 = vector.broadcast %372 : vector<1x128xi1> to vector<2x128xi1>
    %374 = arith.select %373, %367, %371 : vector<2x128xi1>, vector<2x128xf32>
    %375 = vector.extract_strided_slice %374 {offsets = [0, 0], sizes = [2, 16], strides = [1, 1]} : vector<2x128xf32> to vector<2x16xf32>
    %376 = vector.extract_strided_slice %374 {offsets = [0, 16], sizes = [2, 16], strides = [1, 1]} : vector<2x128xf32> to vector<2x16xf32>
    %377 = vector.extract_strided_slice %374 {offsets = [0, 32], sizes = [2, 16], strides = [1, 1]} : vector<2x128xf32> to vector<2x16xf32>
    %378 = vector.extract_strided_slice %374 {offsets = [0, 48], sizes = [2, 16], strides = [1, 1]} : vector<2x128xf32> to vector<2x16xf32>
    %379 = arith.mulf %376, %332 : vector<2x16xf32>
    %380 = arith.mulf %375, %377 : vector<2x16xf32>
    %381 = arith.addf %379, %380 : vector<2x16xf32>
    %382 = math.tanh %381 : vector<2x16xf32>
    %383 = arith.mulf %378, %382 : vector<2x16xf32>
    %384 = math.tanh %383 : vector<2x16xf32>
    %385 = tpu.concatenate %335, %359 in 1 : vector<2x16xf32>, vector<2x8xf32> -> vector<2x24xf32>
    %386 = arith.truncf %385 : vector<2x24xf32> to vector<2x24xbf16>
    %cst_69 = arith.constant dense<0.000000e+00> : vector<2x128xf32>
    %387 = tpu.matmul %386, %37, %cst_69 {dimension_numbers = #tpu.dot_dimension_numbers<[1], [0], [0], [1], [0, 0, 1, 1], [], []>} : vector<2x24xbf16>, vector<24x128xbf16>, vector<2x128xf32> -> vector<2x128xf32>
    %388 = vector.broadcast %38 : vector<1x128xf32> to vector<2x128xf32>
    %389 = arith.addf %387, %388 : vector<2x128xf32>
    %390 = vector.broadcast %35 : vector<1x128xf32> to vector<2x128xf32>
    %391 = arith.mulf %389, %390 : vector<2x128xf32>
    %392 = math.tanh %391 : vector<2x128xf32>
    %cst_70 = arith.constant 5.000000e-01 : f32
    %393 = vector.broadcast %cst_70 : f32 to vector<2x128xf32>
    %394 = arith.mulf %393, %392 : vector<2x128xf32>
    %cst_71 = arith.constant 5.000000e-01 : f32
    %395 = vector.broadcast %cst_71 : f32 to vector<2x128xf32>
    %396 = arith.addf %394, %395 : vector<2x128xf32>
    %397 = vector.shape_cast %32 : vector<1x128xi1> to vector<1x128xi1>
    %398 = vector.broadcast %397 : vector<1x128xi1> to vector<2x128xi1>
    %399 = arith.select %398, %392, %396 : vector<2x128xi1>, vector<2x128xf32>
    %400 = vector.extract_strided_slice %399 {offsets = [0, 0], sizes = [2, 8], strides = [1, 1]} : vector<2x128xf32> to vector<2x8xf32>
    %401 = vector.extract_strided_slice %399 {offsets = [0, 8], sizes = [2, 8], strides = [1, 1]} : vector<2x128xf32> to vector<2x8xf32>
    %402 = vector.extract_strided_slice %399 {offsets = [0, 16], sizes = [2, 8], strides = [1, 1]} : vector<2x128xf32> to vector<2x8xf32>
    %403 = vector.extract_strided_slice %399 {offsets = [0, 24], sizes = [2, 8], strides = [1, 1]} : vector<2x128xf32> to vector<2x8xf32>
    %404 = arith.mulf %401, %357 : vector<2x8xf32>
    %405 = arith.mulf %400, %402 : vector<2x8xf32>
    %406 = arith.addf %404, %405 : vector<2x8xf32>
    %407 = math.tanh %406 : vector<2x8xf32>
    %408 = arith.mulf %403, %407 : vector<2x8xf32>
    %409 = math.tanh %408 : vector<2x8xf32>
    %410 = tpu.concatenate %384, %408 in 1 : vector<2x16xf32>, vector<2x8xf32> -> vector<2x24xf32>
    %411 = arith.truncf %410 : vector<2x24xf32> to vector<2x24xbf16>
    %cst_72 = arith.constant dense<0.000000e+00> : vector<2x128xf32>
    %412 = tpu.matmul %411, %37, %cst_72 {dimension_numbers = #tpu.dot_dimension_numbers<[1], [0], [0], [1], [0, 0, 1, 1], [], []>} : vector<2x24xbf16>, vector<24x128xbf16>, vector<2x128xf32> -> vector<2x128xf32>
    %413 = vector.broadcast %38 : vector<1x128xf32> to vector<2x128xf32>
    %414 = arith.addf %412, %413 : vector<2x128xf32>
    %415 = vector.broadcast %35 : vector<1x128xf32> to vector<2x128xf32>
    %416 = arith.mulf %414, %415 : vector<2x128xf32>
    %417 = math.tanh %416 : vector<2x128xf32>
    %cst_73 = arith.constant 5.000000e-01 : f32
    %418 = vector.broadcast %cst_73 : f32 to vector<2x128xf32>
    %419 = arith.mulf %418, %417 : vector<2x128xf32>
    %cst_74 = arith.constant 5.000000e-01 : f32
    %420 = vector.broadcast %cst_74 : f32 to vector<2x128xf32>
    %421 = arith.addf %419, %420 : vector<2x128xf32>
    %422 = vector.shape_cast %32 : vector<1x128xi1> to vector<1x128xi1>
    %423 = vector.broadcast %422 : vector<1x128xi1> to vector<2x128xi1>
    %424 = arith.select %423, %417, %421 : vector<2x128xi1>, vector<2x128xf32>
    %425 = vector.extract_strided_slice %424 {offsets = [0, 0], sizes = [2, 8], strides = [1, 1]} : vector<2x128xf32> to vector<2x8xf32>
    %426 = vector.extract_strided_slice %424 {offsets = [0, 8], sizes = [2, 8], strides = [1, 1]} : vector<2x128xf32> to vector<2x8xf32>
    %427 = vector.extract_strided_slice %424 {offsets = [0, 16], sizes = [2, 8], strides = [1, 1]} : vector<2x128xf32> to vector<2x8xf32>
    %428 = vector.extract_strided_slice %424 {offsets = [0, 24], sizes = [2, 8], strides = [1, 1]} : vector<2x128xf32> to vector<2x8xf32>
    %429 = arith.mulf %426, %406 : vector<2x8xf32>
    %430 = arith.mulf %425, %427 : vector<2x8xf32>
    %431 = arith.addf %429, %430 : vector<2x8xf32>
    %432 = math.tanh %431 : vector<2x8xf32>
    %433 = arith.mulf %428, %432 : vector<2x8xf32>
    %434 = math.tanh %433 : vector<2x8xf32>
    %435 = tpu.concatenate %115, %164, %213, %262, %311, %360, %409, %434 in 1 : vector<2x8xf32>, vector<2x8xf32>, vector<2x8xf32>, vector<2x8xf32>, vector<2x8xf32>, vector<2x8xf32>, vector<2x8xf32>, vector<2x8xf32> -> vector<2x64xf32>
    %c0_75 = arith.constant 0 : index
    %c0_76 = arith.constant 0 : index
    %c0_77 = arith.constant 0 : index
    %436 = vector.load %arg9[%c0_75, %c0_76, %c0_77] : memref<1x2x64xf32, #tpu.memory_space<vmem>>, vector<1x2x64xf32>
    %437 = vector.shape_cast %436 : vector<1x2x64xf32> to vector<2x64xf32>
    %438 = vector.shape_cast %435 : vector<2x64xf32> to vector<1x2x64xf32>
    tpu.vector_store %arg9[%c0_75, %c0_76, %c0_77], %438 {strides = array<i32>} : memref<1x2x64xf32, #tpu.memory_space<vmem>>, vector<1x2x64xf32>,
    return
  }
  func.func @transform_0(%arg0: i32) -> (i32, i32, i32) {
    %c0_i32 = arith.constant 0 : i32
    %c0_i32_0 = arith.constant 0 : i32
    %c0_i32_1 = arith.constant 0 : i32
    return %arg0, %c0_i32, %c0_i32_0 : i32, i32, i32
  }
  func.func @transform_1(%arg0: i32) -> (i32, i32) {
    %c0_i32 = arith.constant 0 : i32
    %c0_i32_0 = arith.constant 0 : i32
    %c0_i32_1 = arith.constant 0 : i32
    return %c0_i32, %c0_i32_0 : i32, i32
  }
  func.func @transform_2(%arg0: i32) -> (i32, i32) {
    %c0_i32 = arith.constant 0 : i32
    %c0_i32_0 = arith.constant 0 : i32
    %c0_i32_1 = arith.constant 0 : i32
    return %c0_i32, %c0_i32_0 : i32, i32
  }
  func.func @transform_3(%arg0: i32) -> (i32, i32) {
    %c0_i32 = arith.constant 0 : i32
    %c0_i32_0 = arith.constant 0 : i32
    %c0_i32_1 = arith.constant 0 : i32
    return %c0_i32, %c0_i32_0 : i32, i32
  }
  func.func @transform_4(%arg0: i32) -> (i32, i32) {
    %c0_i32 = arith.constant 0 : i32
    %c0_i32_0 = arith.constant 0 : i32
    %c0_i32_1 = arith.constant 0 : i32
    return %c0_i32, %c0_i32_0 : i32, i32
  }
  func.func @transform_5(%arg0: i32) -> (i32, i32) {
    %c0_i32 = arith.constant 0 : i32
    %c0_i32_0 = arith.constant 0 : i32
    %c0_i32_1 = arith.constant 0 : i32
    return %c0_i32, %c0_i32_0 : i32, i32
  }
  func.func @transform_6(%arg0: i32) -> (i32, i32) {
    %c0_i32 = arith.constant 0 : i32
    %c0_i32_0 = arith.constant 0 : i32
    %c0_i32_1 = arith.constant 0 : i32
    return %c0_i32, %c0_i32_0 : i32, i32
  }
  func.func @transform_7(%arg0: i32) -> (i32, i32) {
    %c0_i32 = arith.constant 0 : i32
    %c0_i32_0 = arith.constant 0 : i32
    %c0_i32_1 = arith.constant 0 : i32
    return %c0_i32, %c0_i32_0 : i32, i32
  }
  func.func @transform_8(%arg0: i32) -> (i32, i32, i32) {
    %c0_i32 = arith.constant 0 : i32
    %c0_i32_0 = arith.constant 0 : i32
    %c0_i32_1 = arith.constant 0 : i32
    return %arg0, %c0_i32, %c0_i32_0 : i32, i32, i32
  }
}

</mosaic_0001>

<bundles_post_ra>
// kernel: tae_encoder_forward.1
= control target key start
LH: loop header
LB: loop body
LE: loop exit
PB: predicated region body
PF: predicated region fallthrough
CT: control target
= control target key end

     0   :  { %13 = vsyncpa [#allocation3], 0  ;;  %s2391_s0 = inlined_call_operand.vmem [shape: bf16[1,16,28], index: 0, kind: input, shape index: {}]   ;;  %s2392_s1 = inlined_call_operand.vmem [shape: bf16[28,32], index: 1, kind: input, shape index: {}]   ;;  %s2393_s2 = inlined_call_operand.hbm [shape: f32[1,32], index: 2, kind: input, shape index: {}]   ;;  %s2394_s3 = inlined_call_operand.vmem [shape: bf16[32,128], index: 3, kind: input, shape index: {}]   ;;  %s2395_s4 = inlined_call_operand.vmem [shape: bf16[16,128], index: 4, kind: input, shape index: {}]   ;;  %s2396_s5 = inlined_call_operand.hbm [shape: f32[1,128], index: 5, kind: input, shape index: {}]   ;;  %s2397_s6 = inlined_call_operand.vmem [shape: bf16[24,128], index: 6, kind: input, shape index: {}]   ;;  %s2398_s7 = inlined_call_operand.hbm [shape: f32[1,128], index: 7, kind: input, shape index: {}]   ;;  %s2399_s8 = inlined_call_operand.vmem [shape: f32[1,2,64], index: 8, kind: output, shape index: {}]  }
   0x1   :  { %14 = vsyncpa [#allocation5], 0  ;;  %s1928_s27 = smov [#allocation4]   ;;  %s1929_s29 = smov [#allocation2]  }
   0x2   :  { %s39_s28 = sshll.u32 %s1928_s27, 4  ;;  %s25_s30 = sshll.u32 %s1929_s29, 4  ;;  %s40_s28 = int_to_ptr.vmem [resolvable:$true] %s39_s28  ;;  %s26_s30 = int_to_ptr.vmem [resolvable:$true] %s25_s30 }
   0x3   :  { %s1872_s9 = scalar_lea.vmem %s40_s28, 16  ;;  %s1876_s10 = scalar_lea.vmem %s40_s28, 32 }
   0x4   :  { %p1873_p0 = scmp.ne.s32.totalorder %s40_s28, %s1872_s9  ;;  %p1877_p1 = scmp.lt.s32.totalorder %s40_s28, %s40_s28 }
   0x5   :  { %p1878_p2 = scmp.lt.s32.totalorder %s1876_s10, %s1872_s9 }
   0x7   :  { %p1879_p3 = por %p1878_p2, %p1877_p1 }
   0x9   :  { %p1880_p4 = pnand %p1879_p3, %p1873_p0 }
   0xb   :  { %1883 = shalt.err (!%p1880_p4)
}
   0xc   :  { %42 = dma.hbm_to_vmem [thread:$0]  %s2396_s5, 16, %s40_s28, [#allocation5]  }
   0xd   :  { %s1892_s13 = scalar_lea.vmem %s26_s30, 16  ;;  %s1896_s14 = scalar_lea.vmem %s26_s30, 32 }
   0xe   :  { %p1893_p5 = scmp.ne.s32.totalorder %s26_s30, %s1892_s13  ;;  %p1897_p6 = scmp.lt.s32.totalorder %s26_s30, %s26_s30 }
   0xf   :  { %p1898_p7 = scmp.lt.s32.totalorder %s1896_s14, %s1892_s13 }
  0x11   :  { %p1899_p8 = por %p1898_p7, %p1897_p6 }
  0x13   :  { %p1900_p9 = pnand %p1899_p8, %p1893_p5 }
  0x15   :  { %1903 = shalt.err (!%p1900_p9)
}
  0x16   :  { %28 = dma.hbm_to_vmem [thread:$0]  %s2393_s2, 16, %s26_s30, [#allocation3]  }
  0x17   :  { %s1930_s17 = smov [#allocation6]  }
  0x18   :  { %s51_s18 = sshll.u32 %s1930_s17, 4  ;;  %s52_s18 = int_to_ptr.vmem [resolvable:$true] %s51_s18 }
  0x19   :  { %s1912_s19 = scalar_lea.vmem %s52_s18, 16  ;;  %s1916_s20 = scalar_lea.vmem %s52_s18, 32 }
  0x1a   :  { %p1913_p10 = scmp.ne.s32.totalorder %s52_s18, %s1912_s19  ;;  %p1917_p11 = scmp.lt.s32.totalorder %s52_s18, %s52_s18 }
  0x1b   :  { %p1918_p12 = scmp.lt.s32.totalorder %s1916_s20, %s1912_s19 }
  0x1d   :  { %p1919_p13 = por %p1918_p12, %p1917_p11 }
  0x1f   :  { %p1920_p0 = pnand %p1919_p13, %p1913_p10 }
  0x21   :  { %1923 = shalt.err (!%p1920_p0)
}
  0x22   :  { %54 = dma.hbm_to_vmem [thread:$0]  %s2398_s7, 16, %s52_s18, [#allocation5]  }
  0x23   :  { %1924 = dma.done.wait [#allocation3], 16  }
  0x24   :  { %1925 = vsyncadd [#allocation3], 4294967280 }
  0x25   :  { %1926 = dma.done.wait [#allocation5], 32  }
  0x26   :  { %1927 = vsyncadd [#allocation5], 4294967264  ;;  %v1931_v0 = vmov 0.0   ;;  %vm1932_vm0 = vmmov 0   ;;  %vm98_vm1 = vcmask 1045504   ;;  %v1761_v3 = vld [vmem:[%s2392_s1] sm:$0xff]   ;;  %v218_v25 = vlaneseq }
  0x27   :  { %1616 = vmatprep.subr.bf16.mxu0 %v1931_v0  ;;  %1620 = vmatprep.mubr.msk.bf16.mxu0 %vm1932_vm0, %v1931_v0  ;;  %v1760_v1 = vld [vmem:[%s2392_s1 + $0x8] sm:$0x3f]   ;;  %v1762_v4 = vld [vmem:[%s2391_s0] sm:$0xff]   ;;  %vm94_vm2 = vcmask 228352   ;;  %v1933_v8 = vmov 0   ;;  %vm173_vm5 = vcmask 261120  }
  0x28   :  { %1624 = vmatprep.subr.bf16.mxu1 %v1931_v0  ;;  %1628 = vmatprep.mubr.msk.bf16.mxu1 %vm1932_vm0, %v1931_v0  ;;  %v100_v2 = vsel %vm98_vm1, %v1760_v1, 0  ;;  %v1763_v5 = vld [vmem:[%s2394_s3 + $0x8] sm:$0xff]   ;;  %v2023_v6 = vld [vmem:[%s2395_s4] sm:$0xff]   ;;  %v2039_v26 = vand.u32 127, %v218_v25  ;;  %v1934_v31 = vmov 0.5   ;;  %s1936_s4 = smov 16  }
  0x29   :  { %1617 = vmatpush3.bf16.msra.mxu0 %v100_v2  ;;  %1625 = vmatpush3.bf16.msra.mxu1 %v1763_v5  ;;  %v1765_v7 = vld [vmem:[%s2394_s3] sm:$0xff]   ;;  %s1935_s3 = smov 96   ;;  %s1937_s30 = smov 32   ;;  %v1766_v49 = vld [vmem:[%s2397_s6 + $0x8] ss:$0 sps:$4 sm:$0xff]   ;;  %vm412_vm9 = vcmask 1043456  }
  0x2a   :  { %1618 = vmatprep.subr.bf16.mxu0 %v1931_v0  ;;  %1626 = vmatprep.subr.bf16.mxu1 %v1931_v0  ;;  %v1542_v9 = vld [vmem:[#allocation2] ss:$0 sm:$0xff]  ;;  %vm220_vm6 = vcmp.ge.s32.totalorder %v2039_v26, 32  ;;  %vm221_vm7 = vcmp.lt.s32.totalorder %v2039_v26, 48  ;;  %v1547_v27 = vld [vmem:[#allocation4] ss:$0 sm:$0xff] }
  0x2b   :  { %vm2043_vm8 = vmand %vm220_vm6, %vm221_vm7  ;;  %v2069_v50 = vsel %vm412_vm9, %v1766_v49, 0  ;;  %v2075_v51 = vld [vmem:[%s2397_s6] sm:$0xff]   ;;  %s1938_s13 = smov 80   ;;  %vm240_vm10 = vcmask 130048   ;;  %vm408_vm11 = vcmask 195584   ;;  %vm224_vm12 = vcmp.ge.s32.totalorder %v2039_v26, 16 }
  0x2c   :  { %v2052_v32 = vsel %vm2043_vm8, 1.0, %v1934_v31  ;;  %vm225_vm13 = vcmp.lt.s32.totalorder %v2039_v26, 24  ;;  %v2103_v5 = vld [vmem:[#allocation6] ss:$0 sm:$0xff]  ;;  %s1939_s6 = smov 112   ;;  %s1940_s14 = smov 8  }
  0x2d   :  { %1619 = vmatpush3.bf16.msra.mxu0 %v1761_v3  ;;  %1627 = vmatpush3.bf16.msra.mxu1 %v1765_v7  ;;  %vm2099_vm14 = vmand %vm224_vm12, %vm225_vm13  ;;  %s1941_s15 = smov 120   ;;  %s1942_s16 = smov 104   ;;  %vm1523_vm15 = vcmask 64512   ;;  %vm1530_vm1 = vcmask 392192  }
  0x2e   :  { %1632 = vmatprep.subr.bf16.mxu0 %v1931_v0  ;;  %1638 = vmatprep.subr.bf16.mxu1 %v1931_v0  ;;  %v2108_v7 = vsel %vm2099_vm14, 1.0, %v1934_v31  ;;  %s1943_s17 = smov 24  }
  0x30   :  { %1621 = vmatmul.mubr.msk.bf16.vlgmr.msra.gmra.mxu0 %vm94_vm2, %v1762_v4  ;;  %vm1532_vm2 = vcmask 457728  }
  0x31   :  { %1634 = vmatprep.mubr.msk.bf16.mxu0 %vm1932_vm0, %v1931_v0  ;;  %1633 = vmatpush3.bf16.msra.mxu0 %v2023_v6 }
  0x32   :  { %1644 = vmatprep.subr.bf16.mxu0 %v1931_v0 }
  0x38   :  { %1635 = vmatmul.mubr.bf16.vlgmr.msra.gmra.mxu0 %v1933_v8 }
  0x39   :  { %1648 = vmatprep.mubr.msk.bf16.mxu0 %vm1932_vm0, %v1931_v0  ;;  %1645 = vmatpush3.bf16.msra.mxu0 %v2069_v50 }
  0x3a   :  { %1646 = vmatprep.subr.bf16.mxu0 %v1931_v0 }
  0x3d   :  { %1647 = vmatpush3.bf16.msra.mxu0 %v2075_v51 }
  0x3e   :  { %1658 = vmatprep.subr.bf16.mxu0 %v1931_v0 }
  0xf0   :  { %v136_v10 = vpop.f32.mrf.mxu0 }
  0xf1   :  { %v137_v11 = vadd.f32 %v1542_v9, %v136_v10 }
  0xf2   :  { %v1622_v12 = vpop.f32.mrf.mxu0 }
  0xf3   :  { %v145_v14 = vmul.f32 0.01, %v137_v11  ;;  %vm143_vm3 = vcmp.gt.f32.partialorder %v137_v11, 0.0 }
  0xf4   :  { %v139_v13 = vpop.f32.mrf.mxu0 }
  0xf5   :  { %v140_v15 = vadd.f32 %v1542_v9, %v139_v13  ;;  %v147_v18 = vsel %vm143_vm3, %v137_v11, %v145_v14  ;;  %vm1534_vm3 = vcmask 517120  }
  0xf6   :  { %v1623_v16 = vpop.f32.mrf.mxu0 }
  0xf7   :  { %vm144_vm4 = vcmp.gt.f32.partialorder %v140_v15, 0.0  ;;  %v146_v17 = vmul.f32 0.01, %v140_v15 }
  0xf8   :  { %v278_v21 = vpop.f32.mrf.mxu0 }
  0xf9   :  { %v148_v19 = vsel %vm144_vm4, %v140_v15, %v146_v17 }
  0xfa   :  { %v149_v20 = vpack.c.bf16 %v148_v19, %v147_v18  ;;  %v1636_v22 = vpop.f32.mrf.mxu0 }
  0xfc   :  { %1629 = vmatmul.mubr.msk.bf16.vlgmr.msra.gmra.mxu1 %vm173_vm5, %v149_v20  ;;  %v281_v23 = vpop.f32.mrf.mxu0 }
  0xfd   :  { %1639 = vmatpush3.bf16.msra.mxu1 %v2023_v6  ;;  %1640 = vmatprep.mubr.msk.bf16.mxu1 %vm1932_vm0, %v1931_v0 }
  0xfe   :  { %1652 = vmatprep.subr.bf16.mxu1 %v1931_v0  ;;  %v1637_v24 = vpop.f32.mrf.mxu0 }
 0x1bc   :  { %v211_v29 = vpop.f32.mrf.mxu1 }
 0x1bd   :  { %v2047_v30 = vadd.f32 %v1547_v27, %v211_v29 }
 0x1be   :  { %v1630_v33 = vpop.f32.mrf.mxu1 }
 0x1bf   :  { %v284_v34 = vadd.f32 %v278_v21, %v2047_v30 }
 0x1c0   :  { %v214_v35 = vpop.f32.mrf.mxu1 }
 0x1c1   :  { %v285_v36 = vmul.f32 %v284_v34, %v2052_v32  ;;  %v2056_v37 = vadd.f32 %v1547_v27, %v214_v35 }
 0x1c2   :  { %v1631_v38 = vpop.f32.mrf.mxu1 }
 0x1c3   :  { %1768 = vtanh.f32 %v285_v36 }
 0x1d0   :  { %v1769_v39 = vpop.eup %1768 }
 0x1d1   :  { %v287_v40 = vmul.f32 0.5, %v1769_v39 }
 0x1d3   :  { %v288_v41 = vadd.f32 0.5, %v287_v40 }
 0x1d5   :  { %v291_v42 = vsel %vm2043_vm8, %v1769_v39, %v288_v41 }
 0x1d6   :  { %294 = vrot.lane.b32.xlu0 %v291_v42, %s1935_s3  ;;  %v292_v45 = vmul.f32 0.0, %v291_v42 }
 0x248   :  { %v295_v43 = vpop.permute.xlu0 %294 }
 0x249   :  { %v297_v44 = vmul.f32 %v295_v43, %v291_v42 }
 0x24b   :  { %299 = vrot.lane.b32.xlu0 %v297_v44, %s1936_s4 }
 0x2bd   :  { %v300_v46 = vpop.permute.xlu0 %299 }
 0x2be   :  { %v2062_v47 = vadd.f32 %v300_v46, %v292_v45 }
 0x2c0   :  { %1770 = vtanh.f32 %v2062_v47  ;;  %v367_v26 = vrot.slane %v2062_v47, 6 }
 0x2cd   :  { %v1771_v48 = vpop.eup %1770 }
 0x2ce   :  { %305 = vrot.lane.b32.xlu1 %v1771_v48, %s1937_s30 }
 0x340   :  { %v306_v52 = vpop.permute.xlu1 %305 }
 0x341   :  { %v308_v53 = vmul.f32 %v306_v52, %v291_v42 }
 0x343   :  { %1772 = vtanh.f32 %v308_v53  ;;  %v310_v54 = vpack.c.bf16 %v308_v53, %v308_v53 }
 0x345   :  { %312 = vrot.lane.b32.xlu1 %v310_v54, %s1938_s13 }
 0x350   :  { %v1773_v55 = vpop.eup %1772 }
 0x351   :  { %388 = vrot.lane.b32.xlu0 %v1773_v55, %s1938_s13 }
 0x3b7   :  { %v313_v56 = vpop.permute.xlu1 %312 }
 0x3b8   :  { %1641 = vmatmul.mubr.msk.bf16.vlgmr.msra.gmra.mxu1 %vm240_vm10, %v313_v56 }
 0x3b9   :  { %1653 = vmatpush3.bf16.msra.mxu1 %v2023_v6  ;;  %1654 = vmatprep.mubr.msk.bf16.mxu1 %vm1932_vm0, %v1931_v0 }
 0x3ba   :  { %1666 = vmatprep.subr.bf16.mxu1 %v1931_v0 }
 0x3c3   :  { %v389_v57 = vpop.permute.xlu0 %388 }
 0x3c4   :  { %v391_v58 = vsel %vm240_vm10, %v389_v57, 0.0 }
 0x3c5   :  { %v392_v59 = vpack.c.bf16 %v391_v58, %v391_v58 }
 0x3c7   :  { %1649 = vmatmul.mubr.msk.bf16.vlgmr.msra.gmra.mxu0 %vm408_vm11, %v392_v59 }
 0x3c8   :  { %1659 = vmatpush3.bf16.msra.mxu0 %v2069_v50  ;;  %1662 = vmatprep.mubr.msk.bf16.mxu0 %vm1932_vm0, %v1931_v0 }
 0x3c9   :  { %1660 = vmatprep.subr.bf16.mxu0 %v1931_v0 }
 0x3cc   :  { %1661 = vmatpush3.bf16.msra.mxu0 %v2075_v51 }
 0x3cd   :  { %1672 = vmatprep.subr.bf16.mxu0 %v1931_v0 }
 0x478   :  { %v351_v60 = vpop.f32.mrf.mxu1 }
 0x479   :  { %v358_v61 = vrot.slane %v351_v60, 6 }
 0x47a   :  { %v1642_v62 = vpop.f32.mrf.mxu1 }
 0x47b   :  { %v360_v63 = vadd.f32 %v358_v61, %v2047_v30 }
 0x47c   :  { %v354_v1 = vpop.f32.mrf.mxu1 }
 0x47d   :  { %v361_v2 = vmul.f32 %v360_v63, %v2052_v32 }
 0x47e   :  { %v1643_v3 = vpop.f32.mrf.mxu1 }
 0x47f   :  { %1774 = vtanh.f32 %v361_v2 }
 0x487   :  { %v450_v8 = vpop.f32.mrf.mxu0 }
 0x488   :  { %v451_v9 = vadd.f32 %v2103_v5, %v450_v8 }
 0x489   :  { %v1650_v10 = vpop.f32.mrf.mxu0 }
 0x48a   :  { %v456_v11 = vmul.f32 %v451_v9, %v2108_v7 }
 0x48b   :  { %v453_v12 = vpop.f32.mrf.mxu0 }
 0x48c   :  { %v1775_v13 = vpop.eup %1774  ;;  %1776 = vtanh.f32 %v456_v11 }
 0x48d   :  { %v1651_v14 = vpop.f32.mrf.mxu0  ;;  %v363_v15 = vmul.f32 0.5, %v1775_v13 }
 0x48f   :  { %v364_v16 = vadd.f32 0.5, %v363_v15 }
 0x491   :  { %v365_v17 = vsel %vm2043_vm8, %v1775_v13, %v364_v16 }
 0x492   :  { %371 = vrot.lane.b32.xlu1 %v365_v17, %s1935_s3  ;;  %v369_v27 = vmul.f32 %v367_v26, %v365_v17 }
 0x499   :  { %v1777_v18 = vpop.eup %1776 }
 0x49a   :  { %v458_v19 = vmul.f32 0.5, %v1777_v18 }
 0x49c   :  { %v459_v20 = vadd.f32 0.5, %v458_v19 }
 0x49e   :  { %v462_v21 = vsel %vm2099_vm14, %v1777_v18, %v459_v20 }
 0x49f   :  { %465 = vrot.lane.b32.xlu0 %v462_v21, %s1939_s6  ;;  %v463_v33 = vmul.f32 0.0, %v462_v21 }
 0x504   :  { %v372_v22 = vpop.permute.xlu1 %371 }
 0x505   :  { %v374_v23 = vmul.f32 %v372_v22, %v365_v17 }
 0x507   :  { %376 = vrot.lane.b32.xlu1 %v374_v23, %s1936_s4 }
 0x511   :  { %v466_v24 = vpop.permute.xlu0 %465 }
 0x512   :  { %v468_v25 = vmul.f32 %v466_v24, %v462_v21 }
 0x514   :  { %470 = vrot.lane.b32.xlu0 %v468_v25, %s1940_s14 }
 0x579   :  { %v377_v29 = vpop.permute.xlu1 %376 }
 0x57a   :  { %v2121_v31 = vadd.f32 %v377_v29, %v369_v27 }
 0x57c   :  { %1778 = vtanh.f32 %v2121_v31 }
 0x586   :  { %v471_v34 = vpop.permute.xlu0 %470 }
 0x587   :  { %v2124_v35 = vadd.f32 %v471_v34, %v463_v33 }
 0x589   :  { %v1779_v36 = vpop.eup %1778  ;;  %1780 = vtanh.f32 %v2124_v35 }
 0x58a   :  { %382 = vrot.lane.b32.xlu1 %v1779_v36, %s1937_s30 }
 0x596   :  { %v1781_v38 = vpop.eup %1780 }
 0x597   :  { %476 = vrot.lane.b32.xlu0 %v1781_v38, %s1936_s4 }
 0x5fc   :  { %v383_v39 = vpop.permute.xlu1 %382 }
 0x5fd   :  { %v385_v40 = vmul.f32 %v383_v39, %v365_v17 }
 0x5ff   :  { %1782 = vtanh.f32 %v385_v40  ;;  %v481_v41 = vpack.c.bf16 %v385_v40, %v385_v40 }
 0x601   :  { %v483_v42 = vrot.slane %v481_v41, 1 }
 0x603   :  { %484 = vrot.lane.b32.xlu1 %v483_v42, %s1938_s13 }
 0x609   :  { %v477_v43 = vpop.permute.xlu0 %476 }
 0x60a   :  { %v2130_v44 = vmul.f32 %v477_v43, %v462_v21  ;;  %v539_v21 = vrot.slane %v2121_v31, 6 }
 0x60c   :  { %v1783_v45 = vpop.eup %1782  ;;  %v564_v46 = vrot.slane %v2130_v44, 6 }
 0x60d   :  { %560 = vrot.lane.b32.xlu0 %v1783_v45, %s1938_s13 }
 0x60e   :  { %565 = vrot.lane.b32.xlu1 %v564_v46, %s1941_s15 }
 0x675   :  { %v485_v47 = vpop.permute.xlu1 %484 }
 0x676   :  { %1655 = vmatmul.mubr.msk.bf16.vlgmr.msra.gmra.mxu1 %vm240_vm10, %v485_v47 }
 0x677   :  { %1667 = vmatpush3.bf16.msra.mxu1 %v2023_v6  ;;  %1668 = vmatprep.mubr.msk.bf16.mxu1 %vm1932_vm0, %v1931_v0 }
 0x678   :  { %1680 = vmatprep.subr.bf16.mxu1 %v1931_v0 }
 0x67f   :  { %v561_v48 = vpop.permute.xlu0 %560 }
 0x680   :  { %v566_v49 = vpop.permute.xlu1 %565 }
 0x681   :  { %v568_v52 = vsel %vm240_vm10, %v561_v48, %v566_v49 }
 0x682   :  { %v569_v53 = vpack.c.bf16 %v568_v52, %v568_v52 }
 0x684   :  { %v571_v54 = vrot.slane %v569_v53, 1 }
 0x686   :  { %1663 = vmatmul.mubr.msk.bf16.vlgmr.msra.gmra.mxu0 %vm408_vm11, %v571_v54 }
 0x687   :  { %1673 = vmatpush3.bf16.msra.mxu0 %v2069_v50  ;;  %1676 = vmatprep.mubr.msk.bf16.mxu0 %vm1932_vm0, %v1931_v0 }
 0x688   :  { %1674 = vmatprep.subr.bf16.mxu0 %v1931_v0 }
 0x68b   :  { %1675 = vmatpush3.bf16.msra.mxu0 %v2075_v51 }
 0x68c   :  { %1686 = vmatprep.subr.bf16.mxu0 %v1931_v0 }
 0x736   :  { %v523_v55 = vpop.f32.mrf.mxu1 }
 0x737   :  { %v530_v56 = vrot.slane %v523_v55, 4 }
 0x738   :  { %v1656_v57 = vpop.f32.mrf.mxu1 }
 0x739   :  { %v532_v58 = vadd.f32 %v530_v56, %v2047_v30 }
 0x73a   :  { %v526_v59 = vpop.f32.mrf.mxu1 }
 0x73b   :  { %v533_v60 = vmul.f32 %v532_v58, %v2052_v32 }
 0x73c   :  { %v1657_v61 = vpop.f32.mrf.mxu1 }
 0x73d   :  { %1784 = vtanh.f32 %v533_v60 }
 0x746   :  { %v609_v62 = vpop.f32.mrf.mxu0 }
 0x747   :  { %v610_v63 = vadd.f32 %v2103_v5, %v609_v62 }
 0x748   :  { %v1664_v1 = vpop.f32.mrf.mxu0 }
 0x749   :  { %v615_v2 = vmul.f32 %v610_v63, %v2108_v7 }
 0x74a   :  { %v1785_v3 = vpop.eup %1784  ;;  %v612_v8 = vpop.f32.mrf.mxu0 }
 0x74b   :  { %1786 = vtanh.f32 %v615_v2  ;;  %v535_v9 = vmul.f32 0.5, %v1785_v3 }
 0x74c   :  { %v1665_v10 = vpop.f32.mrf.mxu0 }
 0x74d   :  { %v536_v11 = vadd.f32 0.5, %v535_v9 }
 0x74f   :  { %v537_v12 = vsel %vm2043_vm8, %v1785_v3, %v536_v11 }
 0x750   :  { %543 = vrot.lane.b32.xlu0 %v537_v12, %s1935_s3  ;;  %v541_v22 = vmul.f32 %v539_v21, %v537_v12 }
 0x758   :  { %v1787_v13 = vpop.eup %1786 }
 0x759   :  { %v617_v14 = vmul.f32 0.5, %v1787_v13 }
 0x75b   :  { %v618_v15 = vadd.f32 0.5, %v617_v14 }
 0x75d   :  { %v619_v16 = vsel %vm2099_vm14, %v1787_v13, %v618_v15 }
 0x75e   :  { %622 = vrot.lane.b32.xlu1 %v619_v16, %s1939_s6  ;;  %v620_v25 = vmul.f32 %v619_v16, %v2124_v35 }
 0x7c2   :  { %v544_v17 = vpop.permute.xlu0 %543 }
 0x7c3   :  { %v546_v18 = vmul.f32 %v544_v17, %v537_v12 }
 0x7c5   :  { %548 = vrot.lane.b32.xlu0 %v546_v18, %s1936_s4 }
 0x7d0   :  { %v623_v19 = vpop.permute.xlu1 %622 }
 0x7d1   :  { %v625_v20 = vmul.f32 %v623_v19, %v619_v16 }
 0x7d3   :  { %627 = vrot.lane.b32.xlu1 %v625_v20, %s1940_s14 }
 0x837   :  { %v549_v23 = vpop.permute.xlu0 %548 }
 0x838   :  { %v2161_v24 = vadd.f32 %v549_v23, %v541_v22 }
 0x83a   :  { %1788 = vtanh.f32 %v2161_v24 }
 0x845   :  { %v628_v26 = vpop.permute.xlu1 %627 }
 0x846   :  { %v2165_v27 = vadd.f32 %v628_v26, %v620_v25 }
 0x847   :  { %v1789_v29 = vpop.eup %1788 }
 0x848   :  { %1790 = vtanh.f32 %v2165_v27  ;;  %554 = vrot.lane.b32.xlu0 %v1789_v29, %s1937_s30 }
 0x855   :  { %v1791_v33 = vpop.eup %1790 }
 0x856   :  { %633 = vrot.lane.b32.xlu1 %v1791_v33, %s1936_s4 }
 0x8ba   :  { %v555_v31 = vpop.permute.xlu0 %554 }
 0x8bb   :  { %v557_v34 = vmul.f32 %v555_v31, %v537_v12 }
 0x8bd   :  { %1792 = vtanh.f32 %v557_v34  ;;  %v638_v36 = vpack.c.bf16 %v557_v34, %v557_v34 }
 0x8bf   :  { %v640_v38 = vrot.slane %v638_v36, 2 }
 0x8c1   :  { %641 = vrot.lane.b32.xlu0 %v640_v38, %s1938_s13 }
 0x8c8   :  { %v634_v39 = vpop.permute.xlu1 %633 }
 0x8c9   :  { %v2171_v35 = vmul.f32 %v634_v39, %v619_v16  ;;  %v696_v16 = vrot.slane %v2161_v24, 6 }
 0x8ca   :  { %v1793_v40 = vpop.eup %1792 }
 0x8cb   :  { %v721_v41 = vrot.slane %v2171_v35, 4  ;;  %717 = vrot.lane.b32.xlu1 %v1793_v40, %s1938_s13 }
 0x8cd   :  { %722 = vrot.lane.b32.xlu0 %v721_v41, %s1941_s15 }
 0x933   :  { %v642_v42 = vpop.permute.xlu0 %641 }
 0x934   :  { %1669 = vmatmul.mubr.msk.bf16.vlgmr.msra.gmra.mxu1 %vm240_vm10, %v642_v42 }
 0x935   :  { %1681 = vmatpush3.bf16.msra.mxu1 %v2023_v6  ;;  %1682 = vmatprep.mubr.msk.bf16.mxu1 %vm1932_vm0, %v1931_v0 }
 0x936   :  { %1694 = vmatprep.subr.bf16.mxu1 %v1931_v0 }
 0x93d   :  { %v718_v43 = vpop.permute.xlu1 %717 }
 0x93f   :  { %v723_v45 = vpop.permute.xlu0 %722 }
 0x940   :  { %v725_v46 = vsel %vm240_vm10, %v718_v43, %v723_v45 }
 0x941   :  { %v726_v47 = vpack.c.bf16 %v725_v46, %v725_v46 }
 0x943   :  { %v728_v48 = vrot.slane %v726_v47, 2 }
 0x945   :  { %1677 = vmatmul.mubr.msk.bf16.vlgmr.msra.gmra.mxu0 %vm408_vm11, %v728_v48 }
 0x946   :  { %1687 = vmatpush3.bf16.msra.mxu0 %v2069_v50  ;;  %1690 = vmatprep.mubr.msk.bf16.mxu0 %vm1932_vm0, %v1931_v0 }
 0x947   :  { %1688 = vmatprep.subr.bf16.mxu0 %v1931_v0 }
 0x94a   :  { %1689 = vmatpush3.bf16.msra.mxu0 %v2075_v51 }
 0x94b   :  { %1700 = vmatprep.subr.bf16.mxu0 %v1931_v0 }
 0x9f4   :  { %v680_v49 = vpop.f32.mrf.mxu1 }
 0x9f5   :  { %v687_v52 = vrot.slane %v680_v49, 2 }
 0x9f6   :  { %v1670_v53 = vpop.f32.mrf.mxu1 }
 0x9f7   :  { %v689_v54 = vadd.f32 %v687_v52, %v2047_v30 }
 0x9f8   :  { %v683_v55 = vpop.f32.mrf.mxu1 }
 0x9f9   :  { %v690_v56 = vmul.f32 %v689_v54, %v2052_v32 }
 0x9fa   :  { %v1671_v57 = vpop.f32.mrf.mxu1 }
 0x9fb   :  { %1794 = vtanh.f32 %v690_v56 }
 0xa05   :  { %v766_v58 = vpop.f32.mrf.mxu0 }
 0xa06   :  { %v767_v59 = vadd.f32 %v2103_v5, %v766_v58 }
 0xa07   :  { %v1678_v60 = vpop.f32.mrf.mxu0 }
 0xa08   :  { %v1795_v61 = vpop.eup %1794  ;;  %v772_v62 = vmul.f32 %v767_v59, %v2108_v7 }
 0xa09   :  { %v769_v63 = vpop.f32.mrf.mxu0  ;;  %v692_v1 = vmul.f32 0.5, %v1795_v61 }
 0xa0a   :  { %1796 = vtanh.f32 %v772_v62 }
 0xa0b   :  { %v1679_v2 = vpop.f32.mrf.mxu0  ;;  %v693_v3 = vadd.f32 0.5, %v692_v1 }
 0xa0d   :  { %v694_v30 = vsel %vm2043_vm8, %v1795_v61, %v693_v3 }
 0xa0e   :  { %700 = vrot.lane.b32.xlu1 %v694_v30, %s1935_s3  ;;  %v698_v17 = vmul.f32 %v696_v16, %v694_v30 }
 0xa17   :  { %v1797_v8 = vpop.eup %1796 }
 0xa18   :  { %v774_v9 = vmul.f32 0.5, %v1797_v8 }
 0xa1a   :  { %v775_v10 = vadd.f32 0.5, %v774_v9 }
 0xa1c   :  { %v776_v11 = vsel %vm2099_vm14, %v1797_v8, %v775_v10 }
 0xa1d   :  { %779 = vrot.lane.b32.xlu0 %v776_v11, %s1939_s6  ;;  %v777_v20 = vmul.f32 %v776_v11, %v2165_v27 }
 0xa80   :  { %v701_v12 = vpop.permute.xlu1 %700 }
 0xa81   :  { %v703_v13 = vmul.f32 %v701_v12, %v694_v30 }
 0xa83   :  { %705 = vrot.lane.b32.xlu1 %v703_v13, %s1936_s4 }
 0xa8f   :  { %v780_v14 = vpop.permute.xlu0 %779 }
 0xa90   :  { %v782_v15 = vmul.f32 %v780_v14, %v776_v11 }
 0xa92   :  { %784 = vrot.lane.b32.xlu0 %v782_v15, %s1940_s14 }
 0xaf5   :  { %v706_v18 = vpop.permute.xlu1 %705 }
 0xaf6   :  { %v2202_v19 = vadd.f32 %v706_v18, %v698_v17 }
 0xaf8   :  { %1798 = vtanh.f32 %v2202_v19 }
 0xb04   :  { %v785_v21 = vpop.permute.xlu0 %784 }
 0xb05   :  { %v1799_v22 = vpop.eup %1798  ;;  %v2206_v23 = vadd.f32 %v785_v21, %v777_v20 }
 0xb06   :  { %711 = vrot.lane.b32.xlu1 %v1799_v22, %s1937_s30 }
 0xb07   :  { %1800 = vtanh.f32 %v2206_v23 }
 0xb14   :  { %v1801_v25 = vpop.eup %1800 }
 0xb15   :  { %790 = vrot.lane.b32.xlu0 %v1801_v25, %s1936_s4 }
 0xb78   :  { %v712_v24 = vpop.permute.xlu1 %711 }
 0xb79   :  { %v714_v26 = vmul.f32 %v712_v24, %v694_v30 }
 0xb7b   :  { %1802 = vtanh.f32 %v714_v26  ;;  %v795_v29 = vpack.c.bf16 %v714_v26, %v714_v26 }
 0xb7d   :  { %v797_v33 = vrot.slane %v795_v29, 3 }
 0xb7f   :  { %798 = vrot.lane.b32.xlu1 %v797_v33, %s1938_s13 }
 0xb87   :  { %v791_v31 = vpop.permute.xlu0 %790 }
 0xb88   :  { %v1803_v27 = vpop.eup %1802  ;;  %v2212_v34 = vmul.f32 %v791_v31, %v776_v11  ;;  %v850_v11 = vrot.slane %v2202_v19, 6 }
 0xb89   :  { %871 = vrot.lane.b32.xlu0 %v1803_v27, %s1938_s13 }
 0xb8a   :  { %v875_v36 = vrot.slane %v2212_v34, 2 }
 0xb8c   :  { %876 = vrot.lane.b32.xlu1 %v875_v36, %s1941_s15 }
 0xbf1   :  { %v799_v38 = vpop.permute.xlu1 %798 }
 0xbf2   :  { %1683 = vmatmul.mubr.msk.bf16.vlgmr.msra.gmra.mxu1 %vm240_vm10, %v799_v38 }
 0xbf3   :  { %1695 = vmatpush3.bf16.msra.mxu1 %v2023_v6  ;;  %1696 = vmatprep.mubr.msk.bf16.mxu1 %vm1932_vm0, %v1931_v0 }
 0xbf4   :  { %1708 = vmatprep.subr.bf16.mxu1 %v1931_v0 }
 0xbfb   :  { %v872_v39 = vpop.permute.xlu0 %871 }
 0xbfe   :  { %v877_v40 = vpop.permute.xlu1 %876 }
 0xbff   :  { %v879_v41 = vsel %vm240_vm10, %v872_v39, %v877_v40 }
 0xc00   :  { %v880_v42 = vpack.c.bf16 %v879_v41, %v879_v41 }
 0xc02   :  { %v882_v43 = vrot.slane %v880_v42, 3 }
 0xc04   :  { %1691 = vmatmul.mubr.msk.bf16.vlgmr.msra.gmra.mxu0 %vm408_vm11, %v882_v43 }
 0xc05   :  { %1701 = vmatpush3.bf16.msra.mxu0 %v2069_v50  ;;  %1704 = vmatprep.mubr.msk.bf16.mxu0 %vm1932_vm0, %v1931_v0 }
 0xc06   :  { %1702 = vmatprep.subr.bf16.mxu0 %v1931_v0 }
 0xc09   :  { %1703 = vmatpush3.bf16.msra.mxu0 %v2075_v51 }
 0xc0a   :  { %1714 = vmatprep.subr.bf16.mxu0 %v1931_v0 }
 0xcb2   :  { %v837_v45 = vpop.f32.mrf.mxu1 }
 0xcb3   :  { %v843_v46 = vadd.f32 %v837_v45, %v2056_v37 }
 0xcb4   :  { %v1684_v47 = vpop.f32.mrf.mxu1 }
 0xcb5   :  { %v844_v48 = vmul.f32 %v843_v46, %v2052_v32 }
 0xcb6   :  { %v840_v49 = vpop.f32.mrf.mxu1 }
 0xcb7   :  { %1804 = vtanh.f32 %v844_v48 }
 0xcb8   :  { %v1685_v52 = vpop.f32.mrf.mxu1 }
 0xcc4   :  { %v1805_v53 = vpop.eup %1804  ;;  %v920_v54 = vpop.f32.mrf.mxu0 }
 0xcc5   :  { %v921_v55 = vadd.f32 %v2103_v5, %v920_v54  ;;  %v846_v56 = vmul.f32 0.5, %v1805_v53 }
 0xcc6   :  { %v1692_v57 = vpop.f32.mrf.mxu0 }
 0xcc7   :  { %v926_v58 = vmul.f32 %v921_v55, %v2108_v7  ;;  %v847_v59 = vadd.f32 0.5, %v846_v56 }
 0xcc8   :  { %v923_v60 = vpop.f32.mrf.mxu0 }
 0xcc9   :  { %1806 = vtanh.f32 %v926_v58  ;;  %v848_v61 = vsel %vm2043_vm8, %v1805_v53, %v847_v59 }
 0xcca   :  { %854 = vrot.lane.b32.xlu0 %v848_v61, %s1935_s3  ;;  %v1693_v62 = vpop.f32.mrf.mxu0  ;;  %v852_v12 = vmul.f32 %v850_v11, %v848_v61 }
 0xcd6   :  { %v1807_v63 = vpop.eup %1806 }
 0xcd7   :  { %v928_v1 = vmul.f32 0.5, %v1807_v63 }
 0xcd9   :  { %v929_v2 = vadd.f32 0.5, %v928_v1 }
 0xcdb   :  { %v930_v3 = vsel %vm2099_vm14, %v1807_v63, %v929_v2 }
 0xcdc   :  { %933 = vrot.lane.b32.xlu1 %v930_v3, %s1939_s6  ;;  %v931_v16 = vmul.f32 %v930_v3, %v2206_v23 }
 0xd3c   :  { %v855_v30 = vpop.permute.xlu0 %854 }
 0xd3d   :  { %v857_v8 = vmul.f32 %v855_v30, %v848_v61 }
 0xd3f   :  { %859 = vrot.lane.b32.xlu0 %v857_v8, %s1936_s4 }
 0xd4e   :  { %v934_v9 = vpop.permute.xlu1 %933 }
 0xd4f   :  { %v936_v10 = vmul.f32 %v934_v9, %v930_v3 }
 0xd51   :  { %938 = vrot.lane.b32.xlu1 %v936_v10, %s1940_s14 }
 0xdb1   :  { %v860_v13 = vpop.permute.xlu0 %859 }
 0xdb2   :  { %v2243_v14 = vadd.f32 %v860_v13, %v852_v12 }
 0xdb4   :  { %1808 = vtanh.f32 %v2243_v14  ;;  %v1006_v2 = vrot.slane %v2243_v14, 6 }
 0xdc1   :  { %v1809_v15 = vpop.eup %1808 }
 0xdc2   :  { %865 = vrot.lane.b32.xlu0 %v1809_v15, %s1937_s30 }
 0xdc3   :  { %v939_v17 = vpop.permute.xlu1 %938 }
 0xdc4   :  { %v2248_v18 = vadd.f32 %v939_v17, %v931_v16 }
 0xdc6   :  { %1810 = vtanh.f32 %v2248_v18 }
 0xdd3   :  { %v1811_v20 = vpop.eup %1810 }
 0xdd4   :  { %944 = vrot.lane.b32.xlu1 %v1811_v20, %s1936_s4 }
 0xe34   :  { %v866_v19 = vpop.permute.xlu0 %865 }
 0xe35   :  { %v868_v21 = vmul.f32 %v866_v19, %v848_v61 }
 0xe37   :  { %1812 = vtanh.f32 %v868_v21  ;;  %v949_v22 = vpack.c.bf16 %v868_v21, %v868_v21 }
 0xe39   :  { %951 = vrot.lane.b32.xlu0 %v949_v22, %s1938_s13 }
 0xe44   :  { %v1813_v25 = vpop.eup %1812 }
 0xe45   :  { %1027 = vrot.lane.b32.xlu1 %v1813_v25, %s1938_s13 }
 0xe46   :  { %v945_v24 = vpop.permute.xlu1 %944 }
 0xe47   :  { %v2254_v26 = vmul.f32 %v945_v24, %v930_v3 }
 0xe49   :  { %1031 = vrot.lane.b32.xlu0 %v2254_v26, %s1941_s15 }
 0xeab   :  { %v952_v23 = vpop.permute.xlu0 %951 }
 0xeac   :  { %1697 = vmatmul.mubr.msk.bf16.vlgmr.msra.gmra.mxu1 %vm240_vm10, %v952_v23 }
 0xead   :  { %1709 = vmatpush3.bf16.msra.mxu1 %v2023_v6  ;;  %1710 = vmatprep.mubr.msk.bf16.mxu1 %vm1932_vm0, %v1931_v0 }
 0xeae   :  { %1722 = vmatprep.subr.bf16.mxu1 %v1931_v0 }
 0xeb7   :  { %v1028_v29 = vpop.permute.xlu1 %1027 }
 0xebb   :  { %v1032_v33 = vpop.permute.xlu0 %1031 }
 0xebc   :  { %v1034_v31 = vsel %vm240_vm10, %v1028_v29, %v1032_v33 }
 0xebd   :  { %v1035_v27 = vpack.c.bf16 %v1034_v31, %v1034_v31 }
 0xebf   :  { %1705 = vmatmul.mubr.msk.bf16.vlgmr.msra.gmra.mxu0 %vm408_vm11, %v1035_v27 }
 0xec0   :  { %1715 = vmatpush3.bf16.msra.mxu0 %v2069_v50  ;;  %1718 = vmatprep.mubr.msk.bf16.mxu0 %vm1932_vm0, %v1931_v0 }
 0xec1   :  { %1716 = vmatprep.subr.bf16.mxu0 %v1931_v0 }
 0xec4   :  { %1717 = vmatpush3.bf16.msra.mxu0 %v2075_v51 }
 0xec5   :  { %1728 = vmatprep.subr.bf16.mxu0 %v1931_v0 }
 0xf6c   :  { %v990_v36 = vpop.f32.mrf.mxu1 }
 0xf6d   :  { %v997_v38 = vrot.slane %v990_v36, 6 }
 0xf6e   :  { %v1698_v39 = vpop.f32.mrf.mxu1 }
 0xf6f   :  { %v999_v40 = vadd.f32 %v997_v38, %v2056_v37 }
 0xf70   :  { %v993_v41 = vpop.f32.mrf.mxu1 }
 0xf71   :  { %v1000_v42 = vmul.f32 %v999_v40, %v2052_v32 }
 0xf72   :  { %v1699_v43 = vpop.f32.mrf.mxu1 }
 0xf73   :  { %1814 = vtanh.f32 %v1000_v42 }
 0xf7f   :  { %v1073_v45 = vpop.f32.mrf.mxu0 }
 0xf80   :  { %v1815_v46 = vpop.eup %1814  ;;  %v1074_v47 = vadd.f32 %v2103_v5, %v1073_v45 }
 0xf81   :  { %v1706_v48 = vpop.f32.mrf.mxu0  ;;  %v1002_v49 = vmul.f32 0.5, %v1815_v46 }
 0xf82   :  { %v1079_v52 = vmul.f32 %v1074_v47, %v2108_v7 }
 0xf83   :  { %v1076_v53 = vpop.f32.mrf.mxu0  ;;  %v1003_v54 = vadd.f32 0.5, %v1002_v49 }
 0xf84   :  { %1816 = vtanh.f32 %v1079_v52 }
 0xf85   :  { %v1707_v55 = vpop.f32.mrf.mxu0  ;;  %v1004_v56 = vsel %vm2043_vm8, %v1815_v46, %v1003_v54 }
 0xf86   :  { %1010 = vrot.lane.b32.xlu1 %v1004_v56, %s1935_s3  ;;  %v1008_v3 = vmul.f32 %v1006_v2, %v1004_v56 }
 0xf91   :  { %v1817_v57 = vpop.eup %1816 }
 0xf92   :  { %v1081_v58 = vmul.f32 0.5, %v1817_v57 }
 0xf94   :  { %v1082_v59 = vadd.f32 0.5, %v1081_v58 }
 0xf96   :  { %v1083_v60 = vsel %vm2099_vm14, %v1817_v57, %v1082_v59 }
 0xf97   :  { %1086 = vrot.lane.b32.xlu0 %v1083_v60, %s1939_s6  ;;  %v1084_v10 = vmul.f32 %v1083_v60, %v2248_v18 }
 0xff8   :  { %v1011_v61 = vpop.permute.xlu1 %1010 }
 0xff9   :  { %v1013_v62 = vmul.f32 %v1011_v61, %v1004_v56 }
 0xffb   :  { %1015 = vrot.lane.b32.xlu1 %v1013_v62, %s1936_s4 }
0x1009   :  { %v1087_v63 = vpop.permute.xlu0 %1086 }
0x100a   :  { %v1089_v1 = vmul.f32 %v1087_v63, %v1083_v60 }
0x100c   :  { %1091 = vrot.lane.b32.xlu0 %v1089_v1, %s1940_s14 }
0x106d   :  { %v1016_v30 = vpop.permute.xlu1 %1015 }
0x106e   :  { %v2284_v8 = vadd.f32 %v1016_v30, %v1008_v3 }
0x1070   :  { %1818 = vtanh.f32 %v2284_v8  ;;  %v1160_v62 = vrot.slane %v2284_v8, 6 }
0x107d   :  { %v1819_v9 = vpop.eup %1818 }
0x107e   :  { %1021 = vrot.lane.b32.xlu1 %v1819_v9, %s1937_s30  ;;  %v1092_v11 = vpop.permute.xlu0 %1091 }
0x107f   :  { %v2289_v12 = vadd.f32 %v1092_v11, %v1084_v10 }
0x1081   :  { %1820 = vtanh.f32 %v2289_v12 }
0x108e   :  { %v1821_v13 = vpop.eup %1820 }
0x108f   :  { %1097 = vrot.lane.b32.xlu0 %v1821_v13, %s1936_s4 }
0x10f0   :  { %v1022_v14 = vpop.permute.xlu1 %1021 }
0x10f1   :  { %v1024_v15 = vmul.f32 %v1022_v14, %v1004_v56 }
0x10f3   :  { %1822 = vtanh.f32 %v1024_v15  ;;  %v1102_v16 = vpack.c.bf16 %v1024_v15, %v1024_v15 }
0x10f5   :  { %v1104_v17 = vrot.slane %v1102_v16, 1 }
0x10f7   :  { %1105 = vrot.lane.b32.xlu1 %v1104_v17, %s1938_s13 }
0x1100   :  { %v1823_v20 = vpop.eup %1822 }
0x1101   :  { %1181 = vrot.lane.b32.xlu0 %v1823_v20, %s1938_s13  ;;  %v1098_v18 = vpop.permute.xlu0 %1097 }
0x1102   :  { %v2295_v19 = vmul.f32 %v1098_v18, %v1083_v60 }
0x1104   :  { %v1185_v21 = vrot.slane %v2295_v19, 6 }
0x1106   :  { %1186 = vrot.lane.b32.xlu1 %v1185_v21, %s1941_s15 }
0x1169   :  { %v1106_v22 = vpop.permute.xlu1 %1105 }
0x116a   :  { %1711 = vmatmul.mubr.msk.bf16.vlgmr.msra.gmra.mxu1 %vm240_vm10, %v1106_v22 }
0x116b   :  { %1723 = vmatpush3.bf16.msra.mxu1 %v2023_v6  ;;  %1724 = vmatprep.mubr.msk.bf16.mxu1 %vm1932_vm0, %v1931_v0 }
0x116c   :  { %1736 = vmatprep.subr.bf16.mxu1 %v1931_v0 }
0x1173   :  { %v1182_v25 = vpop.permute.xlu0 %1181 }
0x1178   :  { %v1187_v24 = vpop.permute.xlu1 %1186 }
0x1179   :  { %v1189_v23 = vsel %vm240_vm10, %v1182_v25, %v1187_v24 }
0x117a   :  { %v1190_v29 = vpack.c.bf16 %v1189_v23, %v1189_v23 }
0x117c   :  { %v1192_v33 = vrot.slane %v1190_v29, 1 }
0x117e   :  { %1719 = vmatmul.mubr.msk.bf16.vlgmr.msra.gmra.mxu0 %vm408_vm11, %v1192_v33 }
0x117f   :  { %1729 = vmatpush3.bf16.msra.mxu0 %v2069_v50  ;;  %1732 = vmatprep.mubr.msk.bf16.mxu0 %vm1932_vm0, %v1931_v0 }
0x1180   :  { %1730 = vmatprep.subr.bf16.mxu0 %v1931_v0 }
0x1183   :  { %1731 = vmatpush3.bf16.msra.mxu0 %v2075_v51 }
0x122a   :  { %v1144_v6 = vpop.f32.mrf.mxu1 }
0x122b   :  { %v1151_v31 = vrot.slane %v1144_v6, 4 }
0x122c   :  { %v1712_v27 = vpop.f32.mrf.mxu1 }
0x122d   :  { %v1153_v36 = vadd.f32 %v1151_v31, %v2056_v37 }
0x122e   :  { %v1147_v38 = vpop.f32.mrf.mxu1 }
0x122f   :  { %v1154_v39 = vmul.f32 %v1153_v36, %v2052_v32 }
0x1230   :  { %v1713_v40 = vpop.f32.mrf.mxu1 }
0x1231   :  { %1824 = vtanh.f32 %v1154_v39 }
0x123e   :  { %v1825_v41 = vpop.eup %1824  ;;  %v1230_v42 = vpop.f32.mrf.mxu0 }
0x123f   :  { %v1231_v43 = vadd.f32 %v2103_v5, %v1230_v42  ;;  %v1156_v45 = vmul.f32 0.5, %v1825_v41 }
0x1240   :  { %v1720_v46 = vpop.f32.mrf.mxu0 }
0x1241   :  { %v1236_v47 = vmul.f32 %v1231_v43, %v2108_v7  ;;  %v1157_v48 = vadd.f32 0.5, %v1156_v45 }
0x1242   :  { %v1233_v49 = vpop.f32.mrf.mxu0 }
0x1243   :  { %1826 = vtanh.f32 %v1236_v47  ;;  %v1158_v52 = vsel %vm2043_vm8, %v1825_v41, %v1157_v48 }
0x1244   :  { %1164 = vrot.lane.b32.xlu0 %v1158_v52, %s1935_s3  ;;  %v1721_v53 = vpop.f32.mrf.mxu0  ;;  %v1162_v63 = vmul.f32 %v1160_v62, %v1158_v52 }
0x1250   :  { %v1827_v54 = vpop.eup %1826 }
0x1251   :  { %v1238_v55 = vmul.f32 0.5, %v1827_v54 }
0x1253   :  { %v1239_v56 = vadd.f32 0.5, %v1238_v55 }
0x1255   :  { %v1240_v57 = vsel %vm2099_vm14, %v1827_v54, %v1239_v56 }
0x1256   :  { %1243 = vrot.lane.b32.xlu1 %v1240_v57, %s1939_s6  ;;  %v1241_v30 = vmul.f32 %v1240_v57, %v2289_v12 }
0x12b6   :  { %v1165_v58 = vpop.permute.xlu0 %1164 }
0x12b7   :  { %v1167_v59 = vmul.f32 %v1165_v58, %v1158_v52 }
0x12b9   :  { %1169 = vrot.lane.b32.xlu0 %v1167_v59, %s1936_s4 }
0x12c8   :  { %v1244_v60 = vpop.permute.xlu1 %1243 }
0x12c9   :  { %v1246_v61 = vmul.f32 %v1244_v60, %v1240_v57 }
0x12cb   :  { %1248 = vrot.lane.b32.xlu1 %v1246_v61, %s1940_s14 }
0x132b   :  { %v1170_v1 = vpop.permute.xlu0 %1169 }
0x132c   :  { %v2324_v2 = vadd.f32 %v1170_v1, %v1162_v63 }
0x132e   :  { %1828 = vtanh.f32 %v2324_v2  ;;  %v1317_v28 = vrot.slane %v2324_v2, 6 }
0x133b   :  { %v1829_v3 = vpop.eup %1828 }
0x133c   :  { %1175 = vrot.lane.b32.xlu0 %v1829_v3, %s1937_s30 }
0x133d   :  { %v1249_v9 = vpop.permute.xlu1 %1248 }
0x133e   :  { %v2329_v10 = vadd.f32 %v1249_v9, %v1241_v30 }
0x1340   :  { %1830 = vtanh.f32 %v2329_v10 }
0x134d   :  { %v1831_v11 = vpop.eup %1830 }
0x134e   :  { %1254 = vrot.lane.b32.xlu1 %v1831_v11, %s1936_s4 }
0x13ae   :  { %v1176_v8 = vpop.permute.xlu0 %1175 }
0x13af   :  { %v1178_v13 = vmul.f32 %v1176_v8, %v1158_v52 }
0x13b1   :  { %1832 = vtanh.f32 %v1178_v13  ;;  %v1259_v14 = vpack.c.bf16 %v1178_v13, %v1178_v13 }
0x13b3   :  { %v1261_v15 = vrot.slane %v1259_v14, 2 }
0x13b5   :  { %1262 = vrot.lane.b32.xlu0 %v1261_v15, %s1938_s13 }
0x13be   :  { %v1833_v16 = vpop.eup %1832 }
0x13bf   :  { %1338 = vrot.lane.b32.xlu1 %v1833_v16, %s1938_s13 }
0x13c0   :  { %v1255_v17 = vpop.permute.xlu1 %1254 }
0x13c1   :  { %v2335_v12 = vmul.f32 %v1255_v17, %v1240_v57 }
0x13c3   :  { %v1342_v20 = vrot.slane %v2335_v12, 4 }
0x13c5   :  { %1343 = vrot.lane.b32.xlu0 %v1342_v20, %s1941_s15 }
0x1427   :  { %v1263_v18 = vpop.permute.xlu0 %1262 }
0x1428   :  { %1725 = vmatmul.mubr.msk.bf16.vlgmr.msra.gmra.mxu1 %vm240_vm10, %v1263_v18 }
0x1429   :  { %1737 = vmatpush3.bf16.msra.mxu1 %v2069_v50  ;;  %1740 = vmatprep.mubr.msk.bf16.mxu1 %vm1932_vm0, %v1931_v0  ;;  %vm1528_vm0 = vcmask 326656  }
0x142a   :  { %1738 = vmatprep.subr.bf16.mxu1 %v1931_v0 }
0x142d   :  { %1739 = vmatpush3.bf16.msra.mxu1 %v2075_v51 }
0x1431   :  { %v1339_v21 = vpop.permute.xlu1 %1338 }
0x1437   :  { %v1344_v22 = vpop.permute.xlu0 %1343 }
0x1438   :  { %v1346_v25 = vsel %vm240_vm10, %v1339_v21, %v1344_v22 }
0x1439   :  { %v1347_v24 = vpack.c.bf16 %v1346_v25, %v1346_v25 }
0x143b   :  { %v1349_v23 = vrot.slane %v1347_v24, 2 }
0x143d   :  { %1733 = vmatmul.mubr.msk.bf16.vlgmr.msra.gmra.mxu0 %vm408_vm11, %v1349_v23 }
0x14e8   :  { %v1301_v29 = vpop.f32.mrf.mxu1 }
0x14e9   :  { %v1308_v33 = vrot.slane %v1301_v29, 2 }
0x14ea   :  { %v1726_v6 = vpop.f32.mrf.mxu1 }
0x14eb   :  { %v1310_v50 = vadd.f32 %v1308_v33, %v2056_v37 }
0x14ec   :  { %v1304_v31 = vpop.f32.mrf.mxu1 }
0x14ed   :  { %v1311_v27 = vmul.f32 %v1310_v50, %v2052_v32 }
0x14ee   :  { %v1727_v36 = vpop.f32.mrf.mxu1 }
0x14ef   :  { %1834 = vtanh.f32 %v1311_v27 }
0x14fc   :  { %v1835_v0 = vpop.eup %1834 }
0x14fd   :  { %v1387_v51 = vpop.f32.mrf.mxu0  ;;  %v1313_v38 = vmul.f32 0.5, %v1835_v0 }
0x14fe   :  { %v1388_v39 = vadd.f32 %v2103_v5, %v1387_v51 }
0x14ff   :  { %v1734_v40 = vpop.f32.mrf.mxu0  ;;  %v1314_v41 = vadd.f32 0.5, %v1313_v38 }
0x1500   :  { %v1393_v42 = vmul.f32 %v1388_v39, %v2108_v7 }
0x1501   :  { %v1390_v43 = vpop.f32.mrf.mxu0  ;;  %v1315_v45 = vsel %vm2043_vm8, %v1835_v0, %v1314_v41 }
0x1502   :  { %1836 = vtanh.f32 %v1393_v42  ;;  %1321 = vrot.lane.b32.xlu1 %v1315_v45, %s1935_s3  ;;  %v1319_v55 = vmul.f32 %v1317_v28, %v1315_v45 }
0x1503   :  { %v1735_v37 = vpop.f32.mrf.mxu0 }
0x150f   :  { %v1837_v32 = vpop.eup %1836 }
0x1510   :  { %v1395_v46 = vmul.f32 0.5, %v1837_v32 }
0x1512   :  { %v1396_v47 = vadd.f32 0.5, %v1395_v46 }
0x1514   :  { %v1397_v48 = vsel %vm2099_vm14, %v1837_v32, %v1396_v47 }
0x1515   :  { %1400 = vrot.lane.b32.xlu0 %v1397_v48, %s1939_s6  ;;  %v1398_v59 = vmul.f32 %v1397_v48, %v2329_v10 }
0x1574   :  { %v1322_v49 = vpop.permute.xlu1 %1321 }
0x1575   :  { %v1324_v52 = vmul.f32 %v1322_v49, %v1315_v45 }
0x1577   :  { %1326 = vrot.lane.b32.xlu1 %v1324_v52, %s1936_s4 }
0x1587   :  { %v1401_v53 = vpop.permute.xlu0 %1400 }
0x1588   :  { %v1403_v54 = vmul.f32 %v1401_v53, %v1397_v48 }
0x158a   :  { %1405 = vrot.lane.b32.xlu0 %v1403_v54, %s1940_s14 }
0x15e9   :  { %v1327_v56 = vpop.permute.xlu1 %1326 }
0x15ea   :  { %v1329_v57 = vadd.f32 %v1327_v56, %v1319_v55 }
0x15ec   :  { %1838 = vtanh.f32 %v1329_v57 }
0x15f9   :  { %v1839_v58 = vpop.eup %1838 }
0x15fa   :  { %1332 = vrot.lane.b32.xlu1 %v1839_v58, %s1937_s30 }
0x15fc   :  { %v1406_v60 = vpop.permute.xlu0 %1405 }
0x15fd   :  { %v1408_v61 = vadd.f32 %v1406_v60, %v1398_v59 }
0x15ff   :  { %1840 = vtanh.f32 %v1408_v61 }
0x160c   :  { %v1841_v62 = vpop.eup %1840 }
0x160d   :  { %1411 = vrot.lane.b32.xlu0 %v1841_v62, %s1936_s4 }
0x166c   :  { %v1333_v63 = vpop.permute.xlu1 %1332 }
0x166d   :  { %v1335_v1 = vmul.f32 %v1333_v63, %v1315_v45 }
0x166f   :  { %1842 = vtanh.f32 %v1335_v1 }
0x167c   :  { %v1843_v3 = vpop.eup %1842 }
0x167d   :  { %1417 = vrot.lane.b32.xlu1 %v1843_v3, %s1938_s13 }
0x167f   :  { %v1412_v2 = vpop.permute.xlu0 %1411 }
0x1680   :  { %v1414_v30 = vmul.f32 %v1412_v2, %v1397_v48 }
0x1682   :  { %v1421_v9 = vrot.slane %v1414_v30, 2 }
0x1684   :  { %1422 = vrot.lane.b32.xlu0 %v1421_v9, %s1941_s15 }
0x16ef   :  { %v1418_v11 = vpop.permute.xlu1 %1417 }
0x16f6   :  { %v1423_v8 = vpop.permute.xlu0 %1422 }
0x16f7   :  { %v1425_v10 = vsel %vm240_vm10, %v1418_v11, %v1423_v8 }
0x16f8   :  { %v1426_v13 = vpack.c.bf16 %v1425_v10, %v1425_v10 }
0x16fa   :  { %v1428_v14 = vrot.slane %v1426_v13, 3 }
0x16fc   :  { %1741 = vmatmul.mubr.msk.bf16.vlgmr.msra.gmra.mxu1 %vm408_vm11, %v1428_v14 }
0x17bc   :  { %v1466_v15 = vpop.f32.mrf.mxu1 }
0x17bd   :  { %v1467_v16 = vadd.f32 %v2103_v5, %v1466_v15 }
0x17be   :  { %v1742_v17 = vpop.f32.mrf.mxu1 }
0x17bf   :  { %v1472_v20 = vmul.f32 %v1467_v16, %v2108_v7 }
0x17c0   :  { %v1469_v18 = vpop.f32.mrf.mxu1 }
0x17c1   :  { %1844 = vtanh.f32 %v1472_v20 }
0x17c2   :  { %v1743_v21 = vpop.f32.mrf.mxu1  ;;  %1846 = vtanh.f32 %v2130_v44 }
0x17c3   :  { %1848 = vtanh.f32 %v2212_v34 }
0x17c4   :  { %1850 = vtanh.f32 %v2335_v12 }
0x17ce   :  { %v1845_v22 = vpop.eup %1844 }
0x17cf   :  { %v1474_v25 = vmul.f32 0.5, %v1845_v22  ;;  %v1847_v7 = vpop.eup %1846 }
0x17d0   :  { %v1849_v33 = vpop.eup %1848 }
0x17d1   :  { %v1475_v24 = vadd.f32 0.5, %v1474_v25  ;;  %v1851_v4 = vpop.eup %1850 }
0x17d3   :  { %v1476_v23 = vsel %vm2099_vm14, %v1845_v22, %v1475_v24 }
0x17d4   :  { %1479 = vrot.lane.b32.xlu1 %v1476_v23, %s1939_s6  ;;  %v1477_v6 = vmul.f32 %v1476_v23, %v1408_v61 }
0x1846   :  { %v1480_v29 = vpop.permute.xlu1 %1479 }
0x1847   :  { %v1482_v5 = vmul.f32 %v1480_v29, %v1476_v23 }
0x1849   :  { %1484 = vrot.lane.b32.xlu0 %v1482_v5, %s1940_s14 }
0x184d   :  { %1496 = vrot.lane.b32.xlu0 %v1847_v7, %s1942_s16 }
0x1851   :  { %1504 = vrot.lane.b32.xlu0 %v1849_v33, %s1941_s15 }
0x1855   :  { %1512 = vrot.lane.b32.xlu0 %v1851_v4, %s1936_s4 }
0x18bb   :  { %v1485_v50 = vpop.permute.xlu0 %1484 }
0x18bc   :  { %v1487_v44 = vadd.f32 %v1485_v50, %v1477_v6 }
0x18be   :  { %1852 = vtanh.f32 %v1487_v44 }
0x18bf   :  { %1854 = vtanh.f32 %v2171_v35  ;;  %v1497_v35 = vpop.permute.xlu0 %1496 }
0x18c0   :  { %1856 = vtanh.f32 %v2295_v19 }
0x18c1   :  { %1858 = vtanh.f32 %v1414_v30 }
0x18c3   :  { %v1505_v39 = vpop.permute.xlu0 %1504 }
0x18c7   :  { %v1513_v45 = vpop.permute.xlu0 %1512 }
0x18cb   :  { %v1853_v34 = vpop.eup %1852 }
0x18cc   :  { %1490 = vrot.lane.b32.xlu1 %v1853_v34, %s1936_s4  ;;  %v1855_v12 = vpop.eup %1854 }
0x18cd   :  { %v1857_v31 = vpop.eup %1856 }
0x18ce   :  { %v1859_v27 = vpop.eup %1858 }
0x18d0   :  { %1500 = vrot.lane.b32.xlu1 %v1855_v12, %s1939_s6 }
0x18d4   :  { %1508 = vrot.lane.b32.xlu1 %v1857_v31, %s1940_s14 }
0x18d8   :  { %1516 = vrot.lane.b32.xlu1 %v1859_v27, %s1943_s17 }
0x193e   :  { %v1491_v36 = vpop.permute.xlu1 %1490 }
0x193f   :  { %v1493_v0 = vmul.f32 %v1491_v36, %v1476_v23 }
0x1941   :  { %1860 = vtanh.f32 %v1493_v0 }
0x1942   :  { %1862 = vtanh.f32 %v2254_v26  ;;  %v1501_v19 = vpop.permute.xlu1 %1500 }
0x1943   :  { %v1524_v38 = vsel %vm1523_vm15, %v1497_v35, %v1501_v19 }
0x1944   :  { %v1525_v40 = vsel %vm240_vm10, %v1524_v38, %v1505_v39 }
0x1946   :  { %v1509_v41 = vpop.permute.xlu1 %1508 }
0x194a   :  { %v1517_v32 = vpop.permute.xlu1 %1516 }
0x194e   :  { %v1861_v51 = vpop.eup %1860 }
0x194f   :  { %1520 = vrot.lane.b32.xlu0 %v1861_v51, %s1937_s30  ;;  %v1863_v42 = vpop.eup %1862 }
0x1950   :  { %v1526_v43 = vsel %vm408_vm11, %v1525_v40, %v1863_v42 }
0x1951   :  { %v1527_v37 = vsel %vm173_vm5, %v1526_v43, %v1509_v41 }
0x1952   :  { %v1529_v46 = vsel %vm1528_vm0, %v1527_v37, %v1513_v45 }
0x1953   :  { %v1531_v26 = vsel %vm1530_vm1, %v1529_v46, %v1517_v32 }
0x19c1   :  { %v1521_v47 = vpop.permute.xlu0 %1520 }
0x19c2   :  { %v1533_v48 = vsel %vm1532_vm2, %v1531_v26, %v1521_v47 }
0x19c3   :  { %1535 = vst.msk [vmem:[%s2399_s8] sm:$0x3] %vm1534_vm3, %v1533_v48 }
0x19c4   :  { %1540 = vsyncpa [#allocation3], 1 }
0x19c5   :  { %1541 = vsyncpa [#allocation5], 1 }

</bundles_post_ra>
